<compile_context>
chip_gen: v7x
topology: tpu7x:2x2x1
jax: 0.10.0
libtpu: 0.0.40
codegen_flags: <defaults>
</compile_context>

<pallas_src>
import functools

import jax
import jax.numpy as jnp
from jax.experimental import pallas as pl
from jax.experimental.pallas import tpu as pltpu


def _layer_norm(x, gamma, beta, eps=1e-5):
    # x: (M, D) f32; gamma/beta: (1, D) any float dtype
    mean = jnp.mean(x, axis=-1, keepdims=True)
    var = jnp.mean((x - mean) ** 2, axis=-1, keepdims=True)
    inv = jax.lax.rsqrt(var + eps)
    return (x - mean) * inv * gamma.astype(jnp.float32) + beta.astype(jnp.float32)


def _transformer_layer_kernel(
    x_ref,        # (bb, S, D)
    wqkv_ref,     # (D, 3D)   Q columns pre-scaled by 1/sqrt(dh)
    bqkv_ref,     # (1, 3D)
    wout_ref,     # (D, D)
    bout_ref,     # (1, D)
    w1_ref,       # (D, F)
    b1_ref,       # (1, F)
    w2_ref,       # (F, D)
    b2_ref,       # (1, D)
    g1_ref,       # (1, D)
    be1_ref,      # (1, D)
    g2_ref,       # (1, D)
    be2_ref,      # (1, D)
    o_ref,        # (bb, S, D)
    *,
    num_heads: int,
):
    bb, S, D = x_ref.shape
    H = num_heads
    dh = D // H
    M = bb * S
    mm_dtype = wqkv_ref.dtype   # f32 or bf16; elementwise math stays f32

    # Flatten the batch block into the GEMM M dimension (bigger MXU M).
    x2d = x_ref[...].reshape(M, D).astype(jnp.float32)

    def mm(a, w_ref, b_ref):
        # matmul inputs in mm_dtype (bf16 on the fast path), f32 accumulation.
        return (jnp.dot(a.astype(mm_dtype), w_ref[...],
                        preferred_element_type=jnp.float32)
                + b_ref[...].astype(jnp.float32))

    # ---- fused QKV projection (one (M, D) x (D, 3D) GEMM) ----------------
    qkv = mm(x2d, wqkv_ref, bqkv_ref)                       # (M, 3D) f32

    # Hoist the three full, 128-lane-aligned Q/K/V slabs once; cast once so
    # the attention matmuls run in mm_dtype with f32 accumulation.
    q_all = qkv[:, 0 * D:1 * D].astype(mm_dtype)             # (M, D)
    k_all = qkv[:, 1 * D:2 * D].astype(mm_dtype)             # (M, D)
    v_all = qkv[:, 2 * D:3 * D].astype(mm_dtype)             # (M, D)

    # ---- multi-head self-attention: per (batch-row, head) loop -----------
    # Only one (S, S) score block is live at a time; per-head context stays in
    # registers and heads are concatenated back into a lane-dense (M, D) slab.
    # (Query scale is already folded into wqkv -> no per-head multiply.)
    # TODO(synk): production S -> fori_loop + flash-style online softmax.
    row_ctx = []
    for b in range(bb):
        r0 = b * S
        head_ctx = []
        for h in range(H):
            c0 = h * dh
            q = q_all[r0:r0 + S, c0:c0 + dh]                 # (S, dh)
            k = k_all[r0:r0 + S, c0:c0 + dh]
            v = v_all[r0:r0 + S, c0:c0 + dh]
            s = jax.lax.dot_general(q, k, (((1,), (1,)), ((), ())),
                                    preferred_element_type=jnp.float32)  # (S, S)
            s = s - jnp.max(s, axis=-1, keepdims=True)
            p = jnp.exp(s)
            inv = pl.reciprocal(jnp.sum(p, axis=-1, keepdims=True), approx=True)
            p = (p * inv).astype(mm_dtype)
            head_ctx.append(jnp.dot(p, v, preferred_element_type=jnp.float32))
        row_ctx.append(jnp.concatenate(head_ctx, axis=-1))    # (S, D)
    ctx = jnp.concatenate(row_ctx, axis=0)                    # (M, D) f32

    attn_out = mm(ctx, wout_ref, bout_ref)                    # (M, D)

    # dropout1 == identity (eval)
    x1 = _layer_norm(x2d + attn_out, g1_ref[...], be1_ref[...])

    # ---- feed-forward -----------------------------------------------------
    h1 = jnp.maximum(mm(x1, w1_ref, b1_ref), 0.0)             # (M, F)
    ff = mm(h1, w2_ref, b2_ref)                               # (M, D)

    # dropout2 == identity (eval)
    x2 = _layer_norm(x1 + ff, g2_ref[...], be2_ref[...])

    o_ref[...] = x2.reshape(bb, S, D).astype(o_ref.dtype)


# ---------------------------------------------------------------------------
# Generation-aware sizing helpers
# ---------------------------------------------------------------------------

def _vmem_cap_bytes():
    """~85% of the generation's physical VMEM (v5e/v6e 128 MiB -> ~108 MiB,
    v7x 64 MiB -> ~54 MiB); conservative 64 MiB fallback if the query fails."""
    try:
        cap = int(pltpu.get_tpu_info().vmem_capacity_bytes)
    except Exception:
        cap = 64 << 20
    return int(cap * 0.85)


def _estimate_vmem_bytes(S, D, F, bb, w_itemsize):
    """Rough per-grid-step VMEM working-set estimate."""
    weights = w_itemsize * (D * 3 * D + 3 * D + D * D + D
                            + D * F + F + F * D + D + 4 * D)   # 1x buffered
    M = bb * S
    acts = 4 * (2 * 2 * bb * S * D             # x / out blocks (double-buffered)
                + M * (3 * D + F + 4 * D))     # qkv, ffn hidden, ctx/residuals (f32)
    return weights + acts + (4 << 20)          # compiler headroom


def _choose_batch_block(B, S, D, F, w_itemsize, vmem_cap):
    """Pick rows-per-grid-step. Default: single step (v5e/v6e have one TC and
    extra steps only shrink the GEMM M dim + add ~0.35 us each). Split into
    two 'parallel' steps (v7x megacore) only when each step still feeds the
    MXU with >= 256 rows. Shrink further only if VMEM would not fit."""
    bb = B
    if B % 2 == 0 and (B // 2) * S >= 256:
        bb = B // 2
    for cand in range(bb, 0, -1):
        if B % cand == 0 and _estimate_vmem_bytes(S, D, F, cand, w_itemsize) <= vmem_cap:
            return cand
    return 1


# ---------------------------------------------------------------------------
# Wrapper
# ---------------------------------------------------------------------------

def transformer_layer(x, params, num_heads, *, batch_block=None,
                      vmem_limit_bytes=None):
    """x: (B, S, D) float32. params: dict of weights (f32 or bf16) that have
    been run through fold_qk_scale (Q columns of wqkv/bqkv pre-scaled)."""
    B, S, D = x.shape
    F = params['w1'].shape[1]
    w_itemsize = jnp.dtype(params['wqkv'].dtype).itemsize
    cap = _vmem_cap_bytes()

    if batch_block is None:
        batch_block = _choose_batch_block(B, S, D, F, w_itemsize, cap)
    bb = batch_block
    assert B % bb == 0, "batch must be divisible by batch_block"
    grid = (B // bb,)

    if vmem_limit_bytes is None:
        est = _estimate_vmem_bytes(S, D, F, bb, w_itemsize)
        vmem_limit_bytes = int(min(max(est, 32 << 20), cap))

    def weight_spec(shape):
        rank = len(shape)
        # Constant index_map across the grid -> single-buffer (no 2x VMEM).
        return pl.BlockSpec(shape, lambda i, _r=rank: (0,) * _r,
                            pipeline_mode=pl.Buffered(1))

    in_specs = [
        pl.BlockSpec((bb, S, D), lambda i: (i, 0, 0)),   # x
        weight_spec((D, 3 * D)),                         # wqkv
        weight_spec((1, 3 * D)),                         # bqkv
        weight_spec((D, D)),                             # wout
        weight_spec((1, D)),                             # bout
        weight_spec((D, F)),                             # w1
        weight_spec((1, F)),                             # b1
        weight_spec((F, D)),                             # w2
        weight_spec((1, D)),                             # b2
        weight_spec((1, D)),                             # gamma1
        weight_spec((1, D)),                             # beta1
        weight_spec((1, D)),                             # gamma2
        weight_spec((1, D)),                             # beta2
    ]

    kernel = functools.partial(_transformer_layer_kernel, num_heads=num_heads)

    return pl.pallas_call(
        kernel,
        out_shape=jax.ShapeDtypeStruct((B, S, D), x.dtype),
        grid_spec=pltpu.PrefetchScalarGridSpec(
            num_scalar_prefetch=0,
            grid=grid,
            in_specs=in_specs,
            out_specs=pl.BlockSpec((bb, S, D), lambda i: (i, 0, 0)),
        ),
        compiler_params=pltpu.CompilerParams(
            dimension_semantics=("parallel",),
            vmem_limit_bytes=vmem_limit_bytes,
        ),
    )(
        x,
        params['wqkv'], params['bqkv'],
        params['wout'], params['bout'],
        params['w1'], params['b1'],
        params['w2'], params['b2'],
        params['gamma1'], params['beta1'],
        params['gamma2'], params['beta2'],
    )


# ---------------------------------------------------------------------------
# Parameter helpers
# ---------------------------------------------------------------------------

def init_params(key, D, F, dtype=jnp.float32):
    ks = jax.random.split(key, 6)
    scale = 0.05
    return {
        'wqkv':   (scale * jax.random.normal(ks[0], (D, 3 * D), jnp.float32)).astype(dtype),
        'bqkv':   jnp.zeros((1, 3 * D), dtype),
        'wout':   (scale * jax.random.normal(ks[1], (D, D), jnp.float32)).astype(dtype),
        'bout':   jnp.zeros((1, D), dtype),
        'w1':     (scale * jax.random.normal(ks[2], (D, F), jnp.float32)).astype(dtype),
        'b1':     0.01 * jnp.ones((1, F), dtype),
        'w2':     (scale * jax.random.normal(ks[3], (F, D), jnp.float32)).astype(dtype),
        'b2':     0.01 * jnp.ones((1, D), dtype),
        'gamma1': jnp.ones((1, D), dtype),
        'beta1':  jnp.zeros((1, D), dtype),
        'gamma2': jnp.ones((1, D), dtype),
        'beta2':  jnp.zeros((1, D), dtype),
    }


def fold_qk_scale(params, num_heads):
    """One-time weight transform: fold the 1/sqrt(head_dim) attention scale
    into the Q columns of the fused QKV weight/bias."""
    D = params['wout'].shape[0]
    dh = D // num_heads
    scale = 1.0 / (dh ** 0.5)
    col_scale = jnp.concatenate([
        jnp.full((1, D), scale, jnp.float32),
        jnp.ones((1, 2 * D), jnp.float32),
    ], axis=-1)
    out = dict(params)
    out['wqkv'] = (params['wqkv'].astype(jnp.float32) * col_scale).astype(params['wqkv'].dtype)
    out['bqkv'] = (params['bqkv'].astype(jnp.float32) * col_scale).astype(params['bqkv'].dtype)
    return out


def reference_jax(x, params, num_heads):
    """Pure-JAX f32 reference with identical semantics (takes UNfolded params;
    matmuls and softmax division are exact f32)."""
    p32 = {k: v.astype(jnp.float32) for k, v in params.items()}
    B, S, D = x.shape
    H = num_heads
    dh = D // H
    out = []
    for b in range(B):
        xb = x[b]
        qkv = xb @ p32['wqkv'] + p32['bqkv'][0]
        q, k, v = qkv[:, :D], qkv[:, D:2 * D], qkv[:, 2 * D:]
        qh = q.reshape(S, H, dh).transpose(1, 0, 2) / (dh ** 0.5)
        kh = k.reshape(S, H, dh).transpose(1, 0, 2)
        vh = v.reshape(S, H, dh).transpose(1, 0, 2)
        p = jax.nn.softmax(jnp.einsum('hqd,hkd->hqk', qh, kh), axis=-1)
        ctx = jnp.einsum('hqk,hkd->hqd', p, vh).transpose(1, 0, 2).reshape(S, D)
        attn = ctx @ p32['wout'] + p32['bout'][0]

        def ln(z, g, be):
            m = z.mean(-1, keepdims=True)
            vv = ((z - m) ** 2).mean(-1, keepdims=True)
            return (z - m) * jax.lax.rsqrt(vv + 1e-5) * g[0] + be[0]

        x1 = ln(xb + attn, p32['gamma1'], p32['beta1'])
        h = jnp.maximum(x1 @ p32['w1'] + p32['b1'][0], 0.0)
        ff = h @ p32['w2'] + p32['b2'][0]
        out.append(ln(x1 + ff, p32['gamma2'], p32['beta2']))
    return jnp.stack(out)


if __name__ == "__main__":
    # batch, seq, timestep_vector_dim (lane-dense), heads, dim_feedforward
    B, S, D, H, F = 4, 8, 128, 4, 256

    key = jax.random.PRNGKey(0)
    kx, kp = jax.random.split(key)
    x = jax.random.normal(kx, (B, S, D), jnp.float32)

    # ---- f32 weights: exact-precision path (matches reference tightly) ----
    params = init_params(kp, D, F, dtype=jnp.float32)
    out = jax.block_until_ready(
        transformer_layer(x, fold_qk_scale(params, H), num_heads=H))
    ref = reference_jax(x, params, num_heads=H)
    assert out.shape == (B, S, D)
    assert jnp.allclose(out, ref, atol=5e-3, rtol=5e-3), "mismatch vs reference (f32)"

    # ---- bf16 weights: recommended perf config on v5e/v6e/v7x -------------
    # All GEMM inputs (activations, attention q/k/v/p) are rounded to bf16
    # with f32 accumulation; reference keeps f32 activations, hence the looser
    # tolerance documents the matmul-input precision change.
    params_bf16 = {k: v.astype(jnp.bfloat16) for k, v in params.items()}
    out_bf16 = jax.block_until_ready(
        transformer_layer(x, fold_qk_scale(params_bf16, H), num_heads=H))
    ref_bf16 = reference_jax(x, params_bf16, num_heads=H)
    assert out_bf16.shape == (B, S, D)
    assert jnp.allclose(out_bf16, ref_bf16, atol=5e-2, rtol=5e-2), \
        "mismatch vs reference (bf16 matmul inputs)"

    print("KERNEL_OK")
</pallas_src>

<mosaic_0001>
module attributes {stable_mosaic.version = 11 : i64} {
  func.func @_transformer_layer_kernel(%arg0: i32, %arg1: memref<4x8x128xf32, #tpu.memory_space<vmem>>, %arg2: memref<128x384xf32, #tpu.memory_space<vmem>>, %arg3: memref<1x384xf32, #tpu.memory_space<vmem>>, %arg4: memref<128x128xf32, #tpu.memory_space<vmem>>, %arg5: memref<1x128xf32, #tpu.memory_space<vmem>>, %arg6: memref<128x256xf32, #tpu.memory_space<vmem>>, %arg7: memref<1x256xf32, #tpu.memory_space<vmem>>, %arg8: memref<256x128xf32, #tpu.memory_space<vmem>>, %arg9: memref<1x128xf32, #tpu.memory_space<vmem>>, %arg10: memref<1x128xf32, #tpu.memory_space<vmem>>, %arg11: memref<1x128xf32, #tpu.memory_space<vmem>>, %arg12: memref<1x128xf32, #tpu.memory_space<vmem>>, %arg13: memref<1x128xf32, #tpu.memory_space<vmem>>, %arg14: memref<4x8x128xf32, #tpu.memory_space<vmem>>) attributes {dimension_semantics = [#tpu.dimension_semantics<parallel>], iteration_bounds = array<i64: 1>, scalar_prefetch = 0 : i64, scratch_operands = 0 : i64, tpu.core_type = #tpu.core_type<tc>, window_params = [{transform_indices = @transform_0, window_bounds = array<i64: 4, 8, 128>}, {pipeline_mode = #tpu.pipeline_mode<synchronous>, transform_indices = @transform_1, window_bounds = array<i64: 128, 384>}, {pipeline_mode = #tpu.pipeline_mode<synchronous>, transform_indices = @transform_2, window_bounds = array<i64: 1, 384>}, {pipeline_mode = #tpu.pipeline_mode<synchronous>, transform_indices = @transform_3, window_bounds = array<i64: 128, 128>}, {pipeline_mode = #tpu.pipeline_mode<synchronous>, transform_indices = @transform_4, window_bounds = array<i64: 1, 128>}, {pipeline_mode = #tpu.pipeline_mode<synchronous>, transform_indices = @transform_5, window_bounds = array<i64: 128, 256>}, {pipeline_mode = #tpu.pipeline_mode<synchronous>, transform_indices = @transform_6, window_bounds = array<i64: 1, 256>}, {pipeline_mode = #tpu.pipeline_mode<synchronous>, transform_indices = @transform_7, window_bounds = array<i64: 256, 128>}, {pipeline_mode = #tpu.pipeline_mode<synchronous>, transform_indices = @transform_8, window_bounds = array<i64: 1, 128>}, {pipeline_mode = #tpu.pipeline_mode<synchronous>, transform_indices = @transform_9, window_bounds = array<i64: 1, 128>}, {pipeline_mode = #tpu.pipeline_mode<synchronous>, transform_indices = @transform_10, window_bounds = array<i64: 1, 128>}, {pipeline_mode = #tpu.pipeline_mode<synchronous>, transform_indices = @transform_11, window_bounds = array<i64: 1, 128>}, {pipeline_mode = #tpu.pipeline_mode<synchronous>, transform_indices = @transform_12, window_bounds = array<i64: 1, 128>}, {transform_indices = @transform_13, window_bounds = array<i64: 4, 8, 128>}]} {
    %c0 = arith.constant 0 : index
    %c0_0 = arith.constant 0 : index
    %c0_1 = arith.constant 0 : index
    %0 = vector.load %arg1[%c0, %c0_0, %c0_1] : memref<4x8x128xf32, #tpu.memory_space<vmem>>, vector<4x8x128xf32>
    %1 = vector.shape_cast %0 : vector<4x8x128xf32> to vector<32x128xf32>
    %c0_2 = arith.constant 0 : index
    %c0_3 = arith.constant 0 : index
    %2 = vector.load %arg2[%c0_2, %c0_3] : memref<128x384xf32, #tpu.memory_space<vmem>>, vector<128x384xf32>
    %cst = arith.constant dense<0.000000e+00> : vector<32x384xf32>
    %3 = tpu.matmul %1, %2, %cst {dimension_numbers = #tpu.dot_dimension_numbers<[1], [0], [0], [1], [0, 0, 1, 1], [], []>} : vector<32x128xf32>, vector<128x384xf32>, vector<32x384xf32> -> vector<32x384xf32>
    %c0_4 = arith.constant 0 : index
    %c0_5 = arith.constant 0 : index
    %4 = vector.load %arg3[%c0_4, %c0_5] : memref<1x384xf32, #tpu.memory_space<vmem>>, vector<1x384xf32>
    %5 = vector.broadcast %4 : vector<1x384xf32> to vector<32x384xf32>
    %6 = arith.addf %3, %5 : vector<32x384xf32>
    %7 = vector.extract_strided_slice %6 {offsets = [0, 0], sizes = [32, 128], strides = [1, 1]} : vector<32x384xf32> to vector<32x128xf32>
    %8 = vector.extract_strided_slice %6 {offsets = [0, 128], sizes = [32, 128], strides = [1, 1]} : vector<32x384xf32> to vector<32x128xf32>
    %9 = vector.extract_strided_slice %6 {offsets = [0, 256], sizes = [32, 128], strides = [1, 1]} : vector<32x384xf32> to vector<32x128xf32>
    %10 = vector.extract_strided_slice %7 {offsets = [0, 0], sizes = [8, 32], strides = [1, 1]} : vector<32x128xf32> to vector<8x32xf32>
    %11 = vector.extract_strided_slice %8 {offsets = [0, 0], sizes = [8, 32], strides = [1, 1]} : vector<32x128xf32> to vector<8x32xf32>
    %12 = vector.extract_strided_slice %9 {offsets = [0, 0], sizes = [8, 32], strides = [1, 1]} : vector<32x128xf32> to vector<8x32xf32>
    %cst_6 = arith.constant dense<0.000000e+00> : vector<8x8xf32>
    %13 = tpu.matmul %10, %11, %cst_6 {dimension_numbers = #tpu.dot_dimension_numbers<[1], [1], [0], [0], [0, 0, 1, 0], [], []>} : vector<8x32xf32>, vector<8x32xf32>, vector<8x8xf32> -> vector<8x8xf32>
    %cst_7 = arith.constant dense<0xFF800000> : vector<8xf32>
    %14 = vector.multi_reduction <maximumf>, %13, %cst_7 [1] : vector<8x8xf32> to vector<8xf32>
    %15 = vector.shape_cast %14 : vector<8xf32> to vector<8x1xf32>
    %16 = vector.broadcast %15 : vector<8x1xf32> to vector<8x8xf32>
    %17 = arith.subf %13, %16 : vector<8x8xf32>
    %18 = math.exp %17 : vector<8x8xf32>
    %cst_8 = arith.constant dense<0.000000e+00> : vector<8xf32>
    %19 = vector.multi_reduction <add>, %18, %cst_8 [1] : vector<8x8xf32> to vector<8xf32>
    %20 = vector.shape_cast %19 : vector<8xf32> to vector<8x1xf32>
    %21 = tpu.reciprocal %20 {approx = true} : vector<8x1xf32> -> vector<8x1xf32>
    %22 = vector.broadcast %21 : vector<8x1xf32> to vector<8x8xf32>
    %23 = arith.mulf %18, %22 : vector<8x8xf32>
    %cst_9 = arith.constant dense<0.000000e+00> : vector<8x32xf32>
    %24 = tpu.matmul %23, %12, %cst_9 {dimension_numbers = #tpu.dot_dimension_numbers<[1], [0], [0], [1], [0, 0, 1, 1], [], []>} : vector<8x8xf32>, vector<8x32xf32>, vector<8x32xf32> -> vector<8x32xf32>
    %25 = vector.extract_strided_slice %7 {offsets = [0, 32], sizes = [8, 32], strides = [1, 1]} : vector<32x128xf32> to vector<8x32xf32>
    %26 = vector.extract_strided_slice %8 {offsets = [0, 32], sizes = [8, 32], strides = [1, 1]} : vector<32x128xf32> to vector<8x32xf32>
    %27 = vector.extract_strided_slice %9 {offsets = [0, 32], sizes = [8, 32], strides = [1, 1]} : vector<32x128xf32> to vector<8x32xf32>
    %cst_10 = arith.constant dense<0.000000e+00> : vector<8x8xf32>
    %28 = tpu.matmul %25, %26, %cst_10 {dimension_numbers = #tpu.dot_dimension_numbers<[1], [1], [0], [0], [0, 0, 1, 0], [], []>} : vector<8x32xf32>, vector<8x32xf32>, vector<8x8xf32> -> vector<8x8xf32>
    %cst_11 = arith.constant dense<0xFF800000> : vector<8xf32>
    %29 = vector.multi_reduction <maximumf>, %28, %cst_11 [1] : vector<8x8xf32> to vector<8xf32>
    %30 = vector.shape_cast %29 : vector<8xf32> to vector<8x1xf32>
    %31 = vector.broadcast %30 : vector<8x1xf32> to vector<8x8xf32>
    %32 = arith.subf %28, %31 : vector<8x8xf32>
    %33 = math.exp %32 : vector<8x8xf32>
    %cst_12 = arith.constant dense<0.000000e+00> : vector<8xf32>
    %34 = vector.multi_reduction <add>, %33, %cst_12 [1] : vector<8x8xf32> to vector<8xf32>
    %35 = vector.shape_cast %34 : vector<8xf32> to vector<8x1xf32>
    %36 = tpu.reciprocal %35 {approx = true} : vector<8x1xf32> -> vector<8x1xf32>
    %37 = vector.broadcast %36 : vector<8x1xf32> to vector<8x8xf32>
    %38 = arith.mulf %33, %37 : vector<8x8xf32>
    %cst_13 = arith.constant dense<0.000000e+00> : vector<8x32xf32>
    %39 = tpu.matmul %38, %27, %cst_13 {dimension_numbers = #tpu.dot_dimension_numbers<[1], [0], [0], [1], [0, 0, 1, 1], [], []>} : vector<8x8xf32>, vector<8x32xf32>, vector<8x32xf32> -> vector<8x32xf32>
    %40 = vector.extract_strided_slice %7 {offsets = [0, 64], sizes = [8, 32], strides = [1, 1]} : vector<32x128xf32> to vector<8x32xf32>
    %41 = vector.extract_strided_slice %8 {offsets = [0, 64], sizes = [8, 32], strides = [1, 1]} : vector<32x128xf32> to vector<8x32xf32>
    %42 = vector.extract_strided_slice %9 {offsets = [0, 64], sizes = [8, 32], strides = [1, 1]} : vector<32x128xf32> to vector<8x32xf32>
    %cst_14 = arith.constant dense<0.000000e+00> : vector<8x8xf32>
    %43 = tpu.matmul %40, %41, %cst_14 {dimension_numbers = #tpu.dot_dimension_numbers<[1], [1], [0], [0], [0, 0, 1, 0], [], []>} : vector<8x32xf32>, vector<8x32xf32>, vector<8x8xf32> -> vector<8x8xf32>
    %cst_15 = arith.constant dense<0xFF800000> : vector<8xf32>
    %44 = vector.multi_reduction <maximumf>, %43, %cst_15 [1] : vector<8x8xf32> to vector<8xf32>
    %45 = vector.shape_cast %44 : vector<8xf32> to vector<8x1xf32>
    %46 = vector.broadcast %45 : vector<8x1xf32> to vector<8x8xf32>
    %47 = arith.subf %43, %46 : vector<8x8xf32>
    %48 = math.exp %47 : vector<8x8xf32>
    %cst_16 = arith.constant dense<0.000000e+00> : vector<8xf32>
    %49 = vector.multi_reduction <add>, %48, %cst_16 [1] : vector<8x8xf32> to vector<8xf32>
    %50 = vector.shape_cast %49 : vector<8xf32> to vector<8x1xf32>
    %51 = tpu.reciprocal %50 {approx = true} : vector<8x1xf32> -> vector<8x1xf32>
    %52 = vector.broadcast %51 : vector<8x1xf32> to vector<8x8xf32>
    %53 = arith.mulf %48, %52 : vector<8x8xf32>
    %cst_17 = arith.constant dense<0.000000e+00> : vector<8x32xf32>
    %54 = tpu.matmul %53, %42, %cst_17 {dimension_numbers = #tpu.dot_dimension_numbers<[1], [0], [0], [1], [0, 0, 1, 1], [], []>} : vector<8x8xf32>, vector<8x32xf32>, vector<8x32xf32> -> vector<8x32xf32>
    %55 = vector.extract_strided_slice %7 {offsets = [0, 96], sizes = [8, 32], strides = [1, 1]} : vector<32x128xf32> to vector<8x32xf32>
    %56 = vector.extract_strided_slice %8 {offsets = [0, 96], sizes = [8, 32], strides = [1, 1]} : vector<32x128xf32> to vector<8x32xf32>
    %57 = vector.extract_strided_slice %9 {offsets = [0, 96], sizes = [8, 32], strides = [1, 1]} : vector<32x128xf32> to vector<8x32xf32>
    %cst_18 = arith.constant dense<0.000000e+00> : vector<8x8xf32>
    %58 = tpu.matmul %55, %56, %cst_18 {dimension_numbers = #tpu.dot_dimension_numbers<[1], [1], [0], [0], [0, 0, 1, 0], [], []>} : vector<8x32xf32>, vector<8x32xf32>, vector<8x8xf32> -> vector<8x8xf32>
    %cst_19 = arith.constant dense<0xFF800000> : vector<8xf32>
    %59 = vector.multi_reduction <maximumf>, %58, %cst_19 [1] : vector<8x8xf32> to vector<8xf32>
    %60 = vector.shape_cast %59 : vector<8xf32> to vector<8x1xf32>
    %61 = vector.broadcast %60 : vector<8x1xf32> to vector<8x8xf32>
    %62 = arith.subf %58, %61 : vector<8x8xf32>
    %63 = math.exp %62 : vector<8x8xf32>
    %cst_20 = arith.constant dense<0.000000e+00> : vector<8xf32>
    %64 = vector.multi_reduction <add>, %63, %cst_20 [1] : vector<8x8xf32> to vector<8xf32>
    %65 = vector.shape_cast %64 : vector<8xf32> to vector<8x1xf32>
    %66 = tpu.reciprocal %65 {approx = true} : vector<8x1xf32> -> vector<8x1xf32>
    %67 = vector.broadcast %66 : vector<8x1xf32> to vector<8x8xf32>
    %68 = arith.mulf %63, %67 : vector<8x8xf32>
    %cst_21 = arith.constant dense<0.000000e+00> : vector<8x32xf32>
    %69 = tpu.matmul %68, %57, %cst_21 {dimension_numbers = #tpu.dot_dimension_numbers<[1], [0], [0], [1], [0, 0, 1, 1], [], []>} : vector<8x8xf32>, vector<8x32xf32>, vector<8x32xf32> -> vector<8x32xf32>
    %70 = tpu.concatenate %24, %39, %54, %69 in 1 : vector<8x32xf32>, vector<8x32xf32>, vector<8x32xf32>, vector<8x32xf32> -> vector<8x128xf32>
    %71 = vector.extract_strided_slice %7 {offsets = [8, 0], sizes = [8, 32], strides = [1, 1]} : vector<32x128xf32> to vector<8x32xf32>
    %72 = vector.extract_strided_slice %8 {offsets = [8, 0], sizes = [8, 32], strides = [1, 1]} : vector<32x128xf32> to vector<8x32xf32>
    %73 = vector.extract_strided_slice %9 {offsets = [8, 0], sizes = [8, 32], strides = [1, 1]} : vector<32x128xf32> to vector<8x32xf32>
    %cst_22 = arith.constant dense<0.000000e+00> : vector<8x8xf32>
    %74 = tpu.matmul %71, %72, %cst_22 {dimension_numbers = #tpu.dot_dimension_numbers<[1], [1], [0], [0], [0, 0, 1, 0], [], []>} : vector<8x32xf32>, vector<8x32xf32>, vector<8x8xf32> -> vector<8x8xf32>
    %cst_23 = arith.constant dense<0xFF800000> : vector<8xf32>
    %75 = vector.multi_reduction <maximumf>, %74, %cst_23 [1] : vector<8x8xf32> to vector<8xf32>
    %76 = vector.shape_cast %75 : vector<8xf32> to vector<8x1xf32>
    %77 = vector.broadcast %76 : vector<8x1xf32> to vector<8x8xf32>
    %78 = arith.subf %74, %77 : vector<8x8xf32>
    %79 = math.exp %78 : vector<8x8xf32>
    %cst_24 = arith.constant dense<0.000000e+00> : vector<8xf32>
    %80 = vector.multi_reduction <add>, %79, %cst_24 [1] : vector<8x8xf32> to vector<8xf32>
    %81 = vector.shape_cast %80 : vector<8xf32> to vector<8x1xf32>
    %82 = tpu.reciprocal %81 {approx = true} : vector<8x1xf32> -> vector<8x1xf32>
    %83 = vector.broadcast %82 : vector<8x1xf32> to vector<8x8xf32>
    %84 = arith.mulf %79, %83 : vector<8x8xf32>
    %cst_25 = arith.constant dense<0.000000e+00> : vector<8x32xf32>
    %85 = tpu.matmul %84, %73, %cst_25 {dimension_numbers = #tpu.dot_dimension_numbers<[1], [0], [0], [1], [0, 0, 1, 1], [], []>} : vector<8x8xf32>, vector<8x32xf32>, vector<8x32xf32> -> vector<8x32xf32>
    %86 = vector.extract_strided_slice %7 {offsets = [8, 32], sizes = [8, 32], strides = [1, 1]} : vector<32x128xf32> to vector<8x32xf32>
    %87 = vector.extract_strided_slice %8 {offsets = [8, 32], sizes = [8, 32], strides = [1, 1]} : vector<32x128xf32> to vector<8x32xf32>
    %88 = vector.extract_strided_slice %9 {offsets = [8, 32], sizes = [8, 32], strides = [1, 1]} : vector<32x128xf32> to vector<8x32xf32>
    %cst_26 = arith.constant dense<0.000000e+00> : vector<8x8xf32>
    %89 = tpu.matmul %86, %87, %cst_26 {dimension_numbers = #tpu.dot_dimension_numbers<[1], [1], [0], [0], [0, 0, 1, 0], [], []>} : vector<8x32xf32>, vector<8x32xf32>, vector<8x8xf32> -> vector<8x8xf32>
    %cst_27 = arith.constant dense<0xFF800000> : vector<8xf32>
    %90 = vector.multi_reduction <maximumf>, %89, %cst_27 [1] : vector<8x8xf32> to vector<8xf32>
    %91 = vector.shape_cast %90 : vector<8xf32> to vector<8x1xf32>
    %92 = vector.broadcast %91 : vector<8x1xf32> to vector<8x8xf32>
    %93 = arith.subf %89, %92 : vector<8x8xf32>
    %94 = math.exp %93 : vector<8x8xf32>
    %cst_28 = arith.constant dense<0.000000e+00> : vector<8xf32>
    %95 = vector.multi_reduction <add>, %94, %cst_28 [1] : vector<8x8xf32> to vector<8xf32>
    %96 = vector.shape_cast %95 : vector<8xf32> to vector<8x1xf32>
    %97 = tpu.reciprocal %96 {approx = true} : vector<8x1xf32> -> vector<8x1xf32>
    %98 = vector.broadcast %97 : vector<8x1xf32> to vector<8x8xf32>
    %99 = arith.mulf %94, %98 : vector<8x8xf32>
    %cst_29 = arith.constant dense<0.000000e+00> : vector<8x32xf32>
    %100 = tpu.matmul %99, %88, %cst_29 {dimension_numbers = #tpu.dot_dimension_numbers<[1], [0], [0], [1], [0, 0, 1, 1], [], []>} : vector<8x8xf32>, vector<8x32xf32>, vector<8x32xf32> -> vector<8x32xf32>
    %101 = vector.extract_strided_slice %7 {offsets = [8, 64], sizes = [8, 32], strides = [1, 1]} : vector<32x128xf32> to vector<8x32xf32>
    %102 = vector.extract_strided_slice %8 {offsets = [8, 64], sizes = [8, 32], strides = [1, 1]} : vector<32x128xf32> to vector<8x32xf32>
    %103 = vector.extract_strided_slice %9 {offsets = [8, 64], sizes = [8, 32], strides = [1, 1]} : vector<32x128xf32> to vector<8x32xf32>
    %cst_30 = arith.constant dense<0.000000e+00> : vector<8x8xf32>
    %104 = tpu.matmul %101, %102, %cst_30 {dimension_numbers = #tpu.dot_dimension_numbers<[1], [1], [0], [0], [0, 0, 1, 0], [], []>} : vector<8x32xf32>, vector<8x32xf32>, vector<8x8xf32> -> vector<8x8xf32>
    %cst_31 = arith.constant dense<0xFF800000> : vector<8xf32>
    %105 = vector.multi_reduction <maximumf>, %104, %cst_31 [1] : vector<8x8xf32> to vector<8xf32>
    %106 = vector.shape_cast %105 : vector<8xf32> to vector<8x1xf32>
    %107 = vector.broadcast %106 : vector<8x1xf32> to vector<8x8xf32>
    %108 = arith.subf %104, %107 : vector<8x8xf32>
    %109 = math.exp %108 : vector<8x8xf32>
    %cst_32 = arith.constant dense<0.000000e+00> : vector<8xf32>
    %110 = vector.multi_reduction <add>, %109, %cst_32 [1] : vector<8x8xf32> to vector<8xf32>
    %111 = vector.shape_cast %110 : vector<8xf32> to vector<8x1xf32>
    %112 = tpu.reciprocal %111 {approx = true} : vector<8x1xf32> -> vector<8x1xf32>
    %113 = vector.broadcast %112 : vector<8x1xf32> to vector<8x8xf32>
    %114 = arith.mulf %109, %113 : vector<8x8xf32>
    %cst_33 = arith.constant dense<0.000000e+00> : vector<8x32xf32>
    %115 = tpu.matmul %114, %103, %cst_33 {dimension_numbers = #tpu.dot_dimension_numbers<[1], [0], [0], [1], [0, 0, 1, 1], [], []>} : vector<8x8xf32>, vector<8x32xf32>, vector<8x32xf32> -> vector<8x32xf32>
    %116 = vector.extract_strided_slice %7 {offsets = [8, 96], sizes = [8, 32], strides = [1, 1]} : vector<32x128xf32> to vector<8x32xf32>
    %117 = vector.extract_strided_slice %8 {offsets = [8, 96], sizes = [8, 32], strides = [1, 1]} : vector<32x128xf32> to vector<8x32xf32>
    %118 = vector.extract_strided_slice %9 {offsets = [8, 96], sizes = [8, 32], strides = [1, 1]} : vector<32x128xf32> to vector<8x32xf32>
    %cst_34 = arith.constant dense<0.000000e+00> : vector<8x8xf32>
    %119 = tpu.matmul %116, %117, %cst_34 {dimension_numbers = #tpu.dot_dimension_numbers<[1], [1], [0], [0], [0, 0, 1, 0], [], []>} : vector<8x32xf32>, vector<8x32xf32>, vector<8x8xf32> -> vector<8x8xf32>
    %cst_35 = arith.constant dense<0xFF800000> : vector<8xf32>
    %120 = vector.multi_reduction <maximumf>, %119, %cst_35 [1] : vector<8x8xf32> to vector<8xf32>
    %121 = vector.shape_cast %120 : vector<8xf32> to vector<8x1xf32>
    %122 = vector.broadcast %121 : vector<8x1xf32> to vector<8x8xf32>
    %123 = arith.subf %119, %122 : vector<8x8xf32>
    %124 = math.exp %123 : vector<8x8xf32>
    %cst_36 = arith.constant dense<0.000000e+00> : vector<8xf32>
    %125 = vector.multi_reduction <add>, %124, %cst_36 [1] : vector<8x8xf32> to vector<8xf32>
    %126 = vector.shape_cast %125 : vector<8xf32> to vector<8x1xf32>
    %127 = tpu.reciprocal %126 {approx = true} : vector<8x1xf32> -> vector<8x1xf32>
    %128 = vector.broadcast %127 : vector<8x1xf32> to vector<8x8xf32>
    %129 = arith.mulf %124, %128 : vector<8x8xf32>
    %cst_37 = arith.constant dense<0.000000e+00> : vector<8x32xf32>
    %130 = tpu.matmul %129, %118, %cst_37 {dimension_numbers = #tpu.dot_dimension_numbers<[1], [0], [0], [1], [0, 0, 1, 1], [], []>} : vector<8x8xf32>, vector<8x32xf32>, vector<8x32xf32> -> vector<8x32xf32>
    %131 = tpu.concatenate %85, %100, %115, %130 in 1 : vector<8x32xf32>, vector<8x32xf32>, vector<8x32xf32>, vector<8x32xf32> -> vector<8x128xf32>
    %132 = vector.extract_strided_slice %7 {offsets = [16, 0], sizes = [8, 32], strides = [1, 1]} : vector<32x128xf32> to vector<8x32xf32>
    %133 = vector.extract_strided_slice %8 {offsets = [16, 0], sizes = [8, 32], strides = [1, 1]} : vector<32x128xf32> to vector<8x32xf32>
    %134 = vector.extract_strided_slice %9 {offsets = [16, 0], sizes = [8, 32], strides = [1, 1]} : vector<32x128xf32> to vector<8x32xf32>
    %cst_38 = arith.constant dense<0.000000e+00> : vector<8x8xf32>
    %135 = tpu.matmul %132, %133, %cst_38 {dimension_numbers = #tpu.dot_dimension_numbers<[1], [1], [0], [0], [0, 0, 1, 0], [], []>} : vector<8x32xf32>, vector<8x32xf32>, vector<8x8xf32> -> vector<8x8xf32>
    %cst_39 = arith.constant dense<0xFF800000> : vector<8xf32>
    %136 = vector.multi_reduction <maximumf>, %135, %cst_39 [1] : vector<8x8xf32> to vector<8xf32>
    %137 = vector.shape_cast %136 : vector<8xf32> to vector<8x1xf32>
    %138 = vector.broadcast %137 : vector<8x1xf32> to vector<8x8xf32>
    %139 = arith.subf %135, %138 : vector<8x8xf32>
    %140 = math.exp %139 : vector<8x8xf32>
    %cst_40 = arith.constant dense<0.000000e+00> : vector<8xf32>
    %141 = vector.multi_reduction <add>, %140, %cst_40 [1] : vector<8x8xf32> to vector<8xf32>
    %142 = vector.shape_cast %141 : vector<8xf32> to vector<8x1xf32>
    %143 = tpu.reciprocal %142 {approx = true} : vector<8x1xf32> -> vector<8x1xf32>
    %144 = vector.broadcast %143 : vector<8x1xf32> to vector<8x8xf32>
    %145 = arith.mulf %140, %144 : vector<8x8xf32>
    %cst_41 = arith.constant dense<0.000000e+00> : vector<8x32xf32>
    %146 = tpu.matmul %145, %134, %cst_41 {dimension_numbers = #tpu.dot_dimension_numbers<[1], [0], [0], [1], [0, 0, 1, 1], [], []>} : vector<8x8xf32>, vector<8x32xf32>, vector<8x32xf32> -> vector<8x32xf32>
    %147 = vector.extract_strided_slice %7 {offsets = [16, 32], sizes = [8, 32], strides = [1, 1]} : vector<32x128xf32> to vector<8x32xf32>
    %148 = vector.extract_strided_slice %8 {offsets = [16, 32], sizes = [8, 32], strides = [1, 1]} : vector<32x128xf32> to vector<8x32xf32>
    %149 = vector.extract_strided_slice %9 {offsets = [16, 32], sizes = [8, 32], strides = [1, 1]} : vector<32x128xf32> to vector<8x32xf32>
    %cst_42 = arith.constant dense<0.000000e+00> : vector<8x8xf32>
    %150 = tpu.matmul %147, %148, %cst_42 {dimension_numbers = #tpu.dot_dimension_numbers<[1], [1], [0], [0], [0, 0, 1, 0], [], []>} : vector<8x32xf32>, vector<8x32xf32>, vector<8x8xf32> -> vector<8x8xf32>
    %cst_43 = arith.constant dense<0xFF800000> : vector<8xf32>
    %151 = vector.multi_reduction <maximumf>, %150, %cst_43 [1] : vector<8x8xf32> to vector<8xf32>
    %152 = vector.shape_cast %151 : vector<8xf32> to vector<8x1xf32>
    %153 = vector.broadcast %152 : vector<8x1xf32> to vector<8x8xf32>
    %154 = arith.subf %150, %153 : vector<8x8xf32>
    %155 = math.exp %154 : vector<8x8xf32>
    %cst_44 = arith.constant dense<0.000000e+00> : vector<8xf32>
    %156 = vector.multi_reduction <add>, %155, %cst_44 [1] : vector<8x8xf32> to vector<8xf32>
    %157 = vector.shape_cast %156 : vector<8xf32> to vector<8x1xf32>
    %158 = tpu.reciprocal %157 {approx = true} : vector<8x1xf32> -> vector<8x1xf32>
    %159 = vector.broadcast %158 : vector<8x1xf32> to vector<8x8xf32>
    %160 = arith.mulf %155, %159 : vector<8x8xf32>
    %cst_45 = arith.constant dense<0.000000e+00> : vector<8x32xf32>
    %161 = tpu.matmul %160, %149, %cst_45 {dimension_numbers = #tpu.dot_dimension_numbers<[1], [0], [0], [1], [0, 0, 1, 1], [], []>} : vector<8x8xf32>, vector<8x32xf32>, vector<8x32xf32> -> vector<8x32xf32>
    %162 = vector.extract_strided_slice %7 {offsets = [16, 64], sizes = [8, 32], strides = [1, 1]} : vector<32x128xf32> to vector<8x32xf32>
    %163 = vector.extract_strided_slice %8 {offsets = [16, 64], sizes = [8, 32], strides = [1, 1]} : vector<32x128xf32> to vector<8x32xf32>
    %164 = vector.extract_strided_slice %9 {offsets = [16, 64], sizes = [8, 32], strides = [1, 1]} : vector<32x128xf32> to vector<8x32xf32>
    %cst_46 = arith.constant dense<0.000000e+00> : vector<8x8xf32>
    %165 = tpu.matmul %162, %163, %cst_46 {dimension_numbers = #tpu.dot_dimension_numbers<[1], [1], [0], [0], [0, 0, 1, 0], [], []>} : vector<8x32xf32>, vector<8x32xf32>, vector<8x8xf32> -> vector<8x8xf32>
    %cst_47 = arith.constant dense<0xFF800000> : vector<8xf32>
    %166 = vector.multi_reduction <maximumf>, %165, %cst_47 [1] : vector<8x8xf32> to vector<8xf32>
    %167 = vector.shape_cast %166 : vector<8xf32> to vector<8x1xf32>
    %168 = vector.broadcast %167 : vector<8x1xf32> to vector<8x8xf32>
    %169 = arith.subf %165, %168 : vector<8x8xf32>
    %170 = math.exp %169 : vector<8x8xf32>
    %cst_48 = arith.constant dense<0.000000e+00> : vector<8xf32>
    %171 = vector.multi_reduction <add>, %170, %cst_48 [1] : vector<8x8xf32> to vector<8xf32>
    %172 = vector.shape_cast %171 : vector<8xf32> to vector<8x1xf32>
    %173 = tpu.reciprocal %172 {approx = true} : vector<8x1xf32> -> vector<8x1xf32>
    %174 = vector.broadcast %173 : vector<8x1xf32> to vector<8x8xf32>
    %175 = arith.mulf %170, %174 : vector<8x8xf32>
    %cst_49 = arith.constant dense<0.000000e+00> : vector<8x32xf32>
    %176 = tpu.matmul %175, %164, %cst_49 {dimension_numbers = #tpu.dot_dimension_numbers<[1], [0], [0], [1], [0, 0, 1, 1], [], []>} : vector<8x8xf32>, vector<8x32xf32>, vector<8x32xf32> -> vector<8x32xf32>
    %177 = vector.extract_strided_slice %7 {offsets = [16, 96], sizes = [8, 32], strides = [1, 1]} : vector<32x128xf32> to vector<8x32xf32>
    %178 = vector.extract_strided_slice %8 {offsets = [16, 96], sizes = [8, 32], strides = [1, 1]} : vector<32x128xf32> to vector<8x32xf32>
    %179 = vector.extract_strided_slice %9 {offsets = [16, 96], sizes = [8, 32], strides = [1, 1]} : vector<32x128xf32> to vector<8x32xf32>
    %cst_50 = arith.constant dense<0.000000e+00> : vector<8x8xf32>
    %180 = tpu.matmul %177, %178, %cst_50 {dimension_numbers = #tpu.dot_dimension_numbers<[1], [1], [0], [0], [0, 0, 1, 0], [], []>} : vector<8x32xf32>, vector<8x32xf32>, vector<8x8xf32> -> vector<8x8xf32>
    %cst_51 = arith.constant dense<0xFF800000> : vector<8xf32>
    %181 = vector.multi_reduction <maximumf>, %180, %cst_51 [1] : vector<8x8xf32> to vector<8xf32>
    %182 = vector.shape_cast %181 : vector<8xf32> to vector<8x1xf32>
    %183 = vector.broadcast %182 : vector<8x1xf32> to vector<8x8xf32>
    %184 = arith.subf %180, %183 : vector<8x8xf32>
    %185 = math.exp %184 : vector<8x8xf32>
    %cst_52 = arith.constant dense<0.000000e+00> : vector<8xf32>
    %186 = vector.multi_reduction <add>, %185, %cst_52 [1] : vector<8x8xf32> to vector<8xf32>
    %187 = vector.shape_cast %186 : vector<8xf32> to vector<8x1xf32>
    %188 = tpu.reciprocal %187 {approx = true} : vector<8x1xf32> -> vector<8x1xf32>
    %189 = vector.broadcast %188 : vector<8x1xf32> to vector<8x8xf32>
    %190 = arith.mulf %185, %189 : vector<8x8xf32>
    %cst_53 = arith.constant dense<0.000000e+00> : vector<8x32xf32>
    %191 = tpu.matmul %190, %179, %cst_53 {dimension_numbers = #tpu.dot_dimension_numbers<[1], [0], [0], [1], [0, 0, 1, 1], [], []>} : vector<8x8xf32>, vector<8x32xf32>, vector<8x32xf32> -> vector<8x32xf32>
    %192 = tpu.concatenate %146, %161, %176, %191 in 1 : vector<8x32xf32>, vector<8x32xf32>, vector<8x32xf32>, vector<8x32xf32> -> vector<8x128xf32>
    %193 = vector.extract_strided_slice %7 {offsets = [24, 0], sizes = [8, 32], strides = [1, 1]} : vector<32x128xf32> to vector<8x32xf32>
    %194 = vector.extract_strided_slice %8 {offsets = [24, 0], sizes = [8, 32], strides = [1, 1]} : vector<32x128xf32> to vector<8x32xf32>
    %195 = vector.extract_strided_slice %9 {offsets = [24, 0], sizes = [8, 32], strides = [1, 1]} : vector<32x128xf32> to vector<8x32xf32>
    %cst_54 = arith.constant dense<0.000000e+00> : vector<8x8xf32>
    %196 = tpu.matmul %193, %194, %cst_54 {dimension_numbers = #tpu.dot_dimension_numbers<[1], [1], [0], [0], [0, 0, 1, 0], [], []>} : vector<8x32xf32>, vector<8x32xf32>, vector<8x8xf32> -> vector<8x8xf32>
    %cst_55 = arith.constant dense<0xFF800000> : vector<8xf32>
    %197 = vector.multi_reduction <maximumf>, %196, %cst_55 [1] : vector<8x8xf32> to vector<8xf32>
    %198 = vector.shape_cast %197 : vector<8xf32> to vector<8x1xf32>
    %199 = vector.broadcast %198 : vector<8x1xf32> to vector<8x8xf32>
    %200 = arith.subf %196, %199 : vector<8x8xf32>
    %201 = math.exp %200 : vector<8x8xf32>
    %cst_56 = arith.constant dense<0.000000e+00> : vector<8xf32>
    %202 = vector.multi_reduction <add>, %201, %cst_56 [1] : vector<8x8xf32> to vector<8xf32>
    %203 = vector.shape_cast %202 : vector<8xf32> to vector<8x1xf32>
    %204 = tpu.reciprocal %203 {approx = true} : vector<8x1xf32> -> vector<8x1xf32>
    %205 = vector.broadcast %204 : vector<8x1xf32> to vector<8x8xf32>
    %206 = arith.mulf %201, %205 : vector<8x8xf32>
    %cst_57 = arith.constant dense<0.000000e+00> : vector<8x32xf32>
    %207 = tpu.matmul %206, %195, %cst_57 {dimension_numbers = #tpu.dot_dimension_numbers<[1], [0], [0], [1], [0, 0, 1, 1], [], []>} : vector<8x8xf32>, vector<8x32xf32>, vector<8x32xf32> -> vector<8x32xf32>
    %208 = vector.extract_strided_slice %7 {offsets = [24, 32], sizes = [8, 32], strides = [1, 1]} : vector<32x128xf32> to vector<8x32xf32>
    %209 = vector.extract_strided_slice %8 {offsets = [24, 32], sizes = [8, 32], strides = [1, 1]} : vector<32x128xf32> to vector<8x32xf32>
    %210 = vector.extract_strided_slice %9 {offsets = [24, 32], sizes = [8, 32], strides = [1, 1]} : vector<32x128xf32> to vector<8x32xf32>
    %cst_58 = arith.constant dense<0.000000e+00> : vector<8x8xf32>
    %211 = tpu.matmul %208, %209, %cst_58 {dimension_numbers = #tpu.dot_dimension_numbers<[1], [1], [0], [0], [0, 0, 1, 0], [], []>} : vector<8x32xf32>, vector<8x32xf32>, vector<8x8xf32> -> vector<8x8xf32>
    %cst_59 = arith.constant dense<0xFF800000> : vector<8xf32>
    %212 = vector.multi_reduction <maximumf>, %211, %cst_59 [1] : vector<8x8xf32> to vector<8xf32>
    %213 = vector.shape_cast %212 : vector<8xf32> to vector<8x1xf32>
    %214 = vector.broadcast %213 : vector<8x1xf32> to vector<8x8xf32>
    %215 = arith.subf %211, %214 : vector<8x8xf32>
    %216 = math.exp %215 : vector<8x8xf32>
    %cst_60 = arith.constant dense<0.000000e+00> : vector<8xf32>
    %217 = vector.multi_reduction <add>, %216, %cst_60 [1] : vector<8x8xf32> to vector<8xf32>
    %218 = vector.shape_cast %217 : vector<8xf32> to vector<8x1xf32>
    %219 = tpu.reciprocal %218 {approx = true} : vector<8x1xf32> -> vector<8x1xf32>
    %220 = vector.broadcast %219 : vector<8x1xf32> to vector<8x8xf32>
    %221 = arith.mulf %216, %220 : vector<8x8xf32>
    %cst_61 = arith.constant dense<0.000000e+00> : vector<8x32xf32>
    %222 = tpu.matmul %221, %210, %cst_61 {dimension_numbers = #tpu.dot_dimension_numbers<[1], [0], [0], [1], [0, 0, 1, 1], [], []>} : vector<8x8xf32>, vector<8x32xf32>, vector<8x32xf32> -> vector<8x32xf32>
    %223 = vector.extract_strided_slice %7 {offsets = [24, 64], sizes = [8, 32], strides = [1, 1]} : vector<32x128xf32> to vector<8x32xf32>
    %224 = vector.extract_strided_slice %8 {offsets = [24, 64], sizes = [8, 32], strides = [1, 1]} : vector<32x128xf32> to vector<8x32xf32>
    %225 = vector.extract_strided_slice %9 {offsets = [24, 64], sizes = [8, 32], strides = [1, 1]} : vector<32x128xf32> to vector<8x32xf32>
    %cst_62 = arith.constant dense<0.000000e+00> : vector<8x8xf32>
    %226 = tpu.matmul %223, %224, %cst_62 {dimension_numbers = #tpu.dot_dimension_numbers<[1], [1], [0], [0], [0, 0, 1, 0], [], []>} : vector<8x32xf32>, vector<8x32xf32>, vector<8x8xf32> -> vector<8x8xf32>
    %cst_63 = arith.constant dense<0xFF800000> : vector<8xf32>
    %227 = vector.multi_reduction <maximumf>, %226, %cst_63 [1] : vector<8x8xf32> to vector<8xf32>
    %228 = vector.shape_cast %227 : vector<8xf32> to vector<8x1xf32>
    %229 = vector.broadcast %228 : vector<8x1xf32> to vector<8x8xf32>
    %230 = arith.subf %226, %229 : vector<8x8xf32>
    %231 = math.exp %230 : vector<8x8xf32>
    %cst_64 = arith.constant dense<0.000000e+00> : vector<8xf32>
    %232 = vector.multi_reduction <add>, %231, %cst_64 [1] : vector<8x8xf32> to vector<8xf32>
    %233 = vector.shape_cast %232 : vector<8xf32> to vector<8x1xf32>
    %234 = tpu.reciprocal %233 {approx = true} : vector<8x1xf32> -> vector<8x1xf32>
    %235 = vector.broadcast %234 : vector<8x1xf32> to vector<8x8xf32>
    %236 = arith.mulf %231, %235 : vector<8x8xf32>
    %cst_65 = arith.constant dense<0.000000e+00> : vector<8x32xf32>
    %237 = tpu.matmul %236, %225, %cst_65 {dimension_numbers = #tpu.dot_dimension_numbers<[1], [0], [0], [1], [0, 0, 1, 1], [], []>} : vector<8x8xf32>, vector<8x32xf32>, vector<8x32xf32> -> vector<8x32xf32>
    %238 = vector.extract_strided_slice %7 {offsets = [24, 96], sizes = [8, 32], strides = [1, 1]} : vector<32x128xf32> to vector<8x32xf32>
    %239 = vector.extract_strided_slice %8 {offsets = [24, 96], sizes = [8, 32], strides = [1, 1]} : vector<32x128xf32> to vector<8x32xf32>
    %240 = vector.extract_strided_slice %9 {offsets = [24, 96], sizes = [8, 32], strides = [1, 1]} : vector<32x128xf32> to vector<8x32xf32>
    %cst_66 = arith.constant dense<0.000000e+00> : vector<8x8xf32>
    %241 = tpu.matmul %238, %239, %cst_66 {dimension_numbers = #tpu.dot_dimension_numbers<[1], [1], [0], [0], [0, 0, 1, 0], [], []>} : vector<8x32xf32>, vector<8x32xf32>, vector<8x8xf32> -> vector<8x8xf32>
    %cst_67 = arith.constant dense<0xFF800000> : vector<8xf32>
    %242 = vector.multi_reduction <maximumf>, %241, %cst_67 [1] : vector<8x8xf32> to vector<8xf32>
    %243 = vector.shape_cast %242 : vector<8xf32> to vector<8x1xf32>
    %244 = vector.broadcast %243 : vector<8x1xf32> to vector<8x8xf32>
    %245 = arith.subf %241, %244 : vector<8x8xf32>
    %246 = math.exp %245 : vector<8x8xf32>
    %cst_68 = arith.constant dense<0.000000e+00> : vector<8xf32>
    %247 = vector.multi_reduction <add>, %246, %cst_68 [1] : vector<8x8xf32> to vector<8xf32>
    %248 = vector.shape_cast %247 : vector<8xf32> to vector<8x1xf32>
    %249 = tpu.reciprocal %248 {approx = true} : vector<8x1xf32> -> vector<8x1xf32>
    %250 = vector.broadcast %249 : vector<8x1xf32> to vector<8x8xf32>
    %251 = arith.mulf %246, %250 : vector<8x8xf32>
    %cst_69 = arith.constant dense<0.000000e+00> : vector<8x32xf32>
    %252 = tpu.matmul %251, %240, %cst_69 {dimension_numbers = #tpu.dot_dimension_numbers<[1], [0], [0], [1], [0, 0, 1, 1], [], []>} : vector<8x8xf32>, vector<8x32xf32>, vector<8x32xf32> -> vector<8x32xf32>
    %253 = tpu.concatenate %207, %222, %237, %252 in 1 : vector<8x32xf32>, vector<8x32xf32>, vector<8x32xf32>, vector<8x32xf32> -> vector<8x128xf32>
    %254 = tpu.concatenate %70, %131, %192, %253 in 0 : vector<8x128xf32>, vector<8x128xf32>, vector<8x128xf32>, vector<8x128xf32> -> vector<32x128xf32>
    %c0_70 = arith.constant 0 : index
    %c0_71 = arith.constant 0 : index
    %255 = vector.load %arg4[%c0_70, %c0_71] : memref<128x128xf32, #tpu.memory_space<vmem>>, vector<128x128xf32>
    %cst_72 = arith.constant dense<0.000000e+00> : vector<32x128xf32>
    %256 = tpu.matmul %254, %255, %cst_72 {dimension_numbers = #tpu.dot_dimension_numbers<[1], [0], [0], [1], [0, 0, 1, 1], [], []>} : vector<32x128xf32>, vector<128x128xf32>, vector<32x128xf32> -> vector<32x128xf32>
    %c0_73 = arith.constant 0 : index
    %c0_74 = arith.constant 0 : index
    %257 = vector.load %arg5[%c0_73, %c0_74] : memref<1x128xf32, #tpu.memory_space<vmem>>, vector<1x128xf32>
    %258 = vector.broadcast %257 : vector<1x128xf32> to vector<32x128xf32>
    %259 = arith.addf %256, %258 : vector<32x128xf32>
    %260 = arith.addf %1, %259 : vector<32x128xf32>
    %c0_75 = arith.constant 0 : index
    %c0_76 = arith.constant 0 : index
    %261 = vector.load %arg10[%c0_75, %c0_76] : memref<1x128xf32, #tpu.memory_space<vmem>>, vector<1x128xf32>
    %c0_77 = arith.constant 0 : index
    %c0_78 = arith.constant 0 : index
    %262 = vector.load %arg11[%c0_77, %c0_78] : memref<1x128xf32, #tpu.memory_space<vmem>>, vector<1x128xf32>
    %cst_79 = arith.constant dense<0.000000e+00> : vector<32xf32>
    %263 = vector.multi_reduction <add>, %260, %cst_79 [1] : vector<32x128xf32> to vector<32xf32>
    %264 = vector.shape_cast %263 : vector<32xf32> to vector<32x1xf32>
    %cst_80 = arith.constant 1.280000e+02 : f32
    %265 = vector.broadcast %cst_80 : f32 to vector<32x1xf32>
    %266 = arith.divf %264, %265 : vector<32x1xf32>
    %267 = vector.broadcast %266 : vector<32x1xf32> to vector<32x128xf32>
    %268 = arith.subf %260, %267 : vector<32x128xf32>
    %269 = arith.mulf %268, %268 : vector<32x128xf32>
    %cst_81 = arith.constant dense<0.000000e+00> : vector<32xf32>
    %270 = vector.multi_reduction <add>, %269, %cst_81 [1] : vector<32x128xf32> to vector<32xf32>
    %271 = vector.shape_cast %270 : vector<32xf32> to vector<32x1xf32>
    %cst_82 = arith.constant 1.280000e+02 : f32
    %272 = vector.broadcast %cst_82 : f32 to vector<32x1xf32>
    %273 = arith.divf %271, %272 : vector<32x1xf32>
    %cst_83 = arith.constant 9.99999974E-6 : f32
    %274 = vector.broadcast %cst_83 : f32 to vector<32x1xf32>
    %275 = arith.addf %273, %274 : vector<32x1xf32>
    %276 = math.rsqrt %275 : vector<32x1xf32>
    %277 = vector.broadcast %266 : vector<32x1xf32> to vector<32x128xf32>
    %278 = arith.subf %260, %277 : vector<32x128xf32>
    %279 = vector.broadcast %276 : vector<32x1xf32> to vector<32x128xf32>
    %280 = arith.mulf %278, %279 : vector<32x128xf32>
    %281 = vector.broadcast %261 : vector<1x128xf32> to vector<32x128xf32>
    %282 = arith.mulf %280, %281 : vector<32x128xf32>
    %283 = vector.broadcast %262 : vector<1x128xf32> to vector<32x128xf32>
    %284 = arith.addf %282, %283 : vector<32x128xf32>
    %c0_84 = arith.constant 0 : index
    %c0_85 = arith.constant 0 : index
    %285 = vector.load %arg6[%c0_84, %c0_85] : memref<128x256xf32, #tpu.memory_space<vmem>>, vector<128x256xf32>
    %cst_86 = arith.constant dense<0.000000e+00> : vector<32x256xf32>
    %286 = tpu.matmul %284, %285, %cst_86 {dimension_numbers = #tpu.dot_dimension_numbers<[1], [0], [0], [1], [0, 0, 1, 1], [], []>} : vector<32x128xf32>, vector<128x256xf32>, vector<32x256xf32> -> vector<32x256xf32>
    %c0_87 = arith.constant 0 : index
    %c0_88 = arith.constant 0 : index
    %287 = vector.load %arg7[%c0_87, %c0_88] : memref<1x256xf32, #tpu.memory_space<vmem>>, vector<1x256xf32>
    %288 = vector.broadcast %287 : vector<1x256xf32> to vector<32x256xf32>
    %289 = arith.addf %286, %288 : vector<32x256xf32>
    %cst_89 = arith.constant 0.000000e+00 : f32
    %290 = vector.broadcast %cst_89 : f32 to vector<32x256xf32>
    %291 = arith.maximumf %289, %290 : vector<32x256xf32>
    %c0_90 = arith.constant 0 : index
    %c0_91 = arith.constant 0 : index
    %292 = vector.load %arg8[%c0_90, %c0_91] : memref<256x128xf32, #tpu.memory_space<vmem>>, vector<256x128xf32>
    %cst_92 = arith.constant dense<0.000000e+00> : vector<32x128xf32>
    %293 = tpu.matmul %291, %292, %cst_92 {dimension_numbers = #tpu.dot_dimension_numbers<[1], [0], [0], [1], [0, 0, 1, 1], [], []>} : vector<32x256xf32>, vector<256x128xf32>, vector<32x128xf32> -> vector<32x128xf32>
    %c0_93 = arith.constant 0 : index
    %c0_94 = arith.constant 0 : index
    %294 = vector.load %arg9[%c0_93, %c0_94] : memref<1x128xf32, #tpu.memory_space<vmem>>, vector<1x128xf32>
    %295 = vector.broadcast %294 : vector<1x128xf32> to vector<32x128xf32>
    %296 = arith.addf %293, %295 : vector<32x128xf32>
    %297 = arith.addf %284, %296 : vector<32x128xf32>
    %c0_95 = arith.constant 0 : index
    %c0_96 = arith.constant 0 : index
    %298 = vector.load %arg12[%c0_95, %c0_96] : memref<1x128xf32, #tpu.memory_space<vmem>>, vector<1x128xf32>
    %c0_97 = arith.constant 0 : index
    %c0_98 = arith.constant 0 : index
    %299 = vector.load %arg13[%c0_97, %c0_98] : memref<1x128xf32, #tpu.memory_space<vmem>>, vector<1x128xf32>
    %cst_99 = arith.constant dense<0.000000e+00> : vector<32xf32>
    %300 = vector.multi_reduction <add>, %297, %cst_99 [1] : vector<32x128xf32> to vector<32xf32>
    %301 = vector.shape_cast %300 : vector<32xf32> to vector<32x1xf32>
    %cst_100 = arith.constant 1.280000e+02 : f32
    %302 = vector.broadcast %cst_100 : f32 to vector<32x1xf32>
    %303 = arith.divf %301, %302 : vector<32x1xf32>
    %304 = vector.broadcast %303 : vector<32x1xf32> to vector<32x128xf32>
    %305 = arith.subf %297, %304 : vector<32x128xf32>
    %306 = arith.mulf %305, %305 : vector<32x128xf32>
    %cst_101 = arith.constant dense<0.000000e+00> : vector<32xf32>
    %307 = vector.multi_reduction <add>, %306, %cst_101 [1] : vector<32x128xf32> to vector<32xf32>
    %308 = vector.shape_cast %307 : vector<32xf32> to vector<32x1xf32>
    %cst_102 = arith.constant 1.280000e+02 : f32
    %309 = vector.broadcast %cst_102 : f32 to vector<32x1xf32>
    %310 = arith.divf %308, %309 : vector<32x1xf32>
    %cst_103 = arith.constant 9.99999974E-6 : f32
    %311 = vector.broadcast %cst_103 : f32 to vector<32x1xf32>
    %312 = arith.addf %310, %311 : vector<32x1xf32>
    %313 = math.rsqrt %312 : vector<32x1xf32>
    %314 = vector.broadcast %303 : vector<32x1xf32> to vector<32x128xf32>
    %315 = arith.subf %297, %314 : vector<32x128xf32>
    %316 = vector.broadcast %313 : vector<32x1xf32> to vector<32x128xf32>
    %317 = arith.mulf %315, %316 : vector<32x128xf32>
    %318 = vector.broadcast %298 : vector<1x128xf32> to vector<32x128xf32>
    %319 = arith.mulf %317, %318 : vector<32x128xf32>
    %320 = vector.broadcast %299 : vector<1x128xf32> to vector<32x128xf32>
    %321 = arith.addf %319, %320 : vector<32x128xf32>
    %322 = vector.shape_cast %321 : vector<32x128xf32> to vector<4x8x128xf32>
    %c0_104 = arith.constant 0 : index
    %c0_105 = arith.constant 0 : index
    %c0_106 = arith.constant 0 : index
    %323 = vector.load %arg14[%c0_104, %c0_105, %c0_106] : memref<4x8x128xf32, #tpu.memory_space<vmem>>, vector<4x8x128xf32>
    tpu.vector_store %arg14[%c0_104, %c0_105, %c0_106], %322 {strides = array<i32>} : memref<4x8x128xf32, #tpu.memory_space<vmem>>, vector<4x8x128xf32>,
    return
  }
  func.func @transform_0(%arg0: i32) -> (i32, i32, i32) {
    %c0_i32 = arith.constant 0 : i32
    %c0_i32_0 = arith.constant 0 : i32
    %c0_i32_1 = arith.constant 0 : i32
    return %arg0, %c0_i32, %c0_i32_0 : i32, i32, i32
  }
  func.func @transform_1(%arg0: i32) -> (i32, i32) {
    %c0_i32 = arith.constant 0 : i32
    %c0_i32_0 = arith.constant 0 : i32
    %c0_i32_1 = arith.constant 0 : i32
    return %c0_i32, %c0_i32_0 : i32, i32
  }
  func.func @transform_2(%arg0: i32) -> (i32, i32) {
    %c0_i32 = arith.constant 0 : i32
    %c0_i32_0 = arith.constant 0 : i32
    %c0_i32_1 = arith.constant 0 : i32
    return %c0_i32, %c0_i32_0 : i32, i32
  }
  func.func @transform_3(%arg0: i32) -> (i32, i32) {
    %c0_i32 = arith.constant 0 : i32
    %c0_i32_0 = arith.constant 0 : i32
    %c0_i32_1 = arith.constant 0 : i32
    return %c0_i32, %c0_i32_0 : i32, i32
  }
  func.func @transform_4(%arg0: i32) -> (i32, i32) {
    %c0_i32 = arith.constant 0 : i32
    %c0_i32_0 = arith.constant 0 : i32
    %c0_i32_1 = arith.constant 0 : i32
    return %c0_i32, %c0_i32_0 : i32, i32
  }
  func.func @transform_5(%arg0: i32) -> (i32, i32) {
    %c0_i32 = arith.constant 0 : i32
    %c0_i32_0 = arith.constant 0 : i32
    %c0_i32_1 = arith.constant 0 : i32
    return %c0_i32, %c0_i32_0 : i32, i32
  }
  func.func @transform_6(%arg0: i32) -> (i32, i32) {
    %c0_i32 = arith.constant 0 : i32
    %c0_i32_0 = arith.constant 0 : i32
    %c0_i32_1 = arith.constant 0 : i32
    return %c0_i32, %c0_i32_0 : i32, i32
  }
  func.func @transform_7(%arg0: i32) -> (i32, i32) {
    %c0_i32 = arith.constant 0 : i32
    %c0_i32_0 = arith.constant 0 : i32
    %c0_i32_1 = arith.constant 0 : i32
    return %c0_i32, %c0_i32_0 : i32, i32
  }
  func.func @transform_8(%arg0: i32) -> (i32, i32) {
    %c0_i32 = arith.constant 0 : i32
    %c0_i32_0 = arith.constant 0 : i32
    %c0_i32_1 = arith.constant 0 : i32
    return %c0_i32, %c0_i32_0 : i32, i32
  }
  func.func @transform_9(%arg0: i32) -> (i32, i32) {
    %c0_i32 = arith.constant 0 : i32
    %c0_i32_0 = arith.constant 0 : i32
    %c0_i32_1 = arith.constant 0 : i32
    return %c0_i32, %c0_i32_0 : i32, i32
  }
  func.func @transform_10(%arg0: i32) -> (i32, i32) {
    %c0_i32 = arith.constant 0 : i32
    %c0_i32_0 = arith.constant 0 : i32
    %c0_i32_1 = arith.constant 0 : i32
    return %c0_i32, %c0_i32_0 : i32, i32
  }
  func.func @transform_11(%arg0: i32) -> (i32, i32) {
    %c0_i32 = arith.constant 0 : i32
    %c0_i32_0 = arith.constant 0 : i32
    %c0_i32_1 = arith.constant 0 : i32
    return %c0_i32, %c0_i32_0 : i32, i32
  }
  func.func @transform_12(%arg0: i32) -> (i32, i32) {
    %c0_i32 = arith.constant 0 : i32
    %c0_i32_0 = arith.constant 0 : i32
    %c0_i32_1 = arith.constant 0 : i32
    return %c0_i32, %c0_i32_0 : i32, i32
  }
  func.func @transform_13(%arg0: i32) -> (i32, i32, i32) {
    %c0_i32 = arith.constant 0 : i32
    %c0_i32_0 = arith.constant 0 : i32
    %c0_i32_1 = arith.constant 0 : i32
    return %arg0, %c0_i32, %c0_i32_0 : i32, i32, i32
  }
}

</mosaic_0001>

<bundles_post_ra>
// kernel: tpu_custom_call.1
= control target key start
LH: loop header
LB: loop body
LE: loop exit
PB: predicated region body
PF: predicated region fallthrough
CT: control target
= control target key end

     0   :  { %18 = vsyncpa [#allocation3], 0  ;;  %s5158_s0 = inlined_call_operand.hbm [shape: f32[4,8,128], index: 0, kind: input, shape index: {}]   ;;  %s5159_s1 = inlined_call_operand.hbm [shape: f32[128,384], index: 1, kind: input, shape index: {}]   ;;  %s5160_s2 = inlined_call_operand.vmem [shape: f32[1,384], index: 2, kind: input, shape index: {}]   ;;  %s5161_s3 = inlined_call_operand.hbm [shape: f32[128,128], index: 3, kind: input, shape index: {}]   ;;  %s5162_s4 = inlined_call_operand.vmem [shape: f32[1,128], index: 4, kind: input, shape index: {}]   ;;  %s5163_s5 = inlined_call_operand.hbm [shape: f32[128,256], index: 5, kind: input, shape index: {}]   ;;  %s5164_s6 = inlined_call_operand.vmem [shape: f32[1,256], index: 6, kind: input, shape index: {}]   ;;  %s5165_s7 = inlined_call_operand.hbm [shape: f32[256,128], index: 7, kind: input, shape index: {}]   ;;  %s5166_s8 = inlined_call_operand.vmem [shape: f32[1,128], index: 8, kind: input, shape index: {}]   ;;  %s5167_s9 = inlined_call_operand.vmem [shape: f32[1,128], index: 9, kind: input, shape index: {}]   ;;  %s5168_s10 = inlined_call_operand.vmem [shape: f32[1,128], index: 10, kind: input, shape index: {}]   ;;  %s5169_s11 = inlined_call_operand.vmem [shape: f32[1,128], index: 11, kind: input, shape index: {}]   ;;  %s5170_s12 = inlined_call_operand.vmem [shape: f32[1,128], index: 12, kind: input, shape index: {}]   ;;  %s5171_s13 = inlined_call_operand.hbm [shape: f32[4,8,128], index: 13, kind: output, shape index: {}]  }
   0x1   :  { %19 = vsyncpa [#allocation6], 0 }
   0x2   :  { %20 = vsyncpa [#allocation9], 0 }
   0x3   :  { %21 = vsyncpa [#allocation4], 0  ;;  %s4466_s25 = smov [#allocation5]   ;;  %s4326_s29 = scalar_lea.hbm %s5159_s1, 6144 }
   0x4   :  { %s39_s26 = sshll.u32 %s4466_s25, 4  ;;  %p4327_p0 = scmp.ne.s32.totalorder %s5159_s1, %s4326_s29  ;;  %s40_s26 = int_to_ptr.vmem [resolvable:$true] %s39_s26 }
   0x5   :  { %p4330_p1 = scmp.lt.u32.totalorder %s4326_s29, %s5159_s1 }
   0x7   :  { %p4332_p2 = pnand %p4330_p1, %p4327_p0 }
   0x9   :  { %4335 = shalt.err (!%p4332_p2)
}
   0xa   :  { %s4336_s17 = scalar_lea.vmem %s40_s26, 6144  ;;  %p4341_p4 = scmp.lt.s32.totalorder %s40_s26, %s40_s26 }
   0xb   :  { %p4337_p3 = scmp.ne.s32.totalorder %s40_s26, %s4336_s17  ;;  %p4342_p5 = scmp.lt.s32.totalorder %s4336_s17, %s4336_s17 }
   0xd   :  { %p4343_p6 = por %p4342_p5, %p4341_p4 }
   0xf   :  { %p4344_p7 = pnand %p4343_p6, %p4337_p3 }
  0x11   :  { %4347 = shalt.err (!%p4344_p7)
}
  0x12   :  { %s4467_s18 = smov 384   ;;  %s4468_s19 = smov 24  }
  0x13   :  { %45 = dma.hbm_to_vmem [thread:$0]  %s5159_s1, 6144, %s40_s26, [#allocation6], %s4467_s18, %s4467_s18, %s4468_s19  }
  0x14   :  { %s4469_s22 = smov [#allocation8]   ;;  %s4348_s27 = scalar_lea.hbm %s5163_s5, 4096 }
  0x15   :  { %s67_s23 = sshll.u32 %s4469_s22, 4  ;;  %p4349_p8 = scmp.ne.s32.totalorder %s5163_s5, %s4348_s27  ;;  %s68_s23 = int_to_ptr.vmem [resolvable:$true] %s67_s23 }
  0x16   :  { %p4352_p9 = scmp.lt.u32.totalorder %s4348_s27, %s5163_s5 }
  0x18   :  { %p4354_p10 = pnand %p4352_p9, %p4349_p8 }
  0x1a   :  { %4357 = shalt.err (!%p4354_p10)
}
  0x1b   :  { %s4358_s15 = scalar_lea.vmem %s68_s23, 4096  ;;  %p4363_p12 = scmp.lt.s32.totalorder %s68_s23, %s68_s23 }
  0x1c   :  { %p4359_p11 = scmp.ne.s32.totalorder %s68_s23, %s4358_s15  ;;  %p4364_p13 = scmp.lt.s32.totalorder %s4358_s15, %s4358_s15 }
  0x1e   :  { %p4365_p0 = por %p4364_p13, %p4363_p12 }
  0x20   :  { %p4366_p1 = pnand %p4365_p0, %p4359_p11 }
  0x22   :  { %4369 = shalt.err (!%p4366_p1)
}
  0x23   :  { %s4470_s1 = smov 256   ;;  %s4471_s26 = smov 16  }
  0x24   :  { %73 = dma.hbm_to_vmem [thread:$0]  %s5163_s5, 4096, %s68_s23, [#allocation9], %s4470_s1, %s4470_s1, %s4471_s26  }
  0x25   :  { %s4472_s18 = smov [#allocation2]   ;;  %s4370_s22 = scalar_lea.hbm %s5158_s0, 512 }
  0x26   :  { %s27_s19 = sshll.u32 %s4472_s18, 4  ;;  %p4371_p2 = scmp.ne.s32.totalorder %s5158_s0, %s4370_s22  ;;  %s28_s19 = int_to_ptr.vmem [resolvable:$true] %s27_s19 }
  0x27   :  { %p4374_p3 = scmp.lt.u32.totalorder %s4370_s22, %s5158_s0 }
  0x29   :  { %p4376_p4 = pnand %p4374_p3, %p4371_p2 }
  0x2b   :  { %4379 = shalt.err (!%p4376_p4)
}
  0x2c   :  { %s4380_s29 = scalar_lea.vmem %s28_s19, 512  ;;  %p4385_p6 = scmp.lt.s32.totalorder %s28_s19, %s28_s19 }
  0x2d   :  { %p4381_p5 = scmp.ne.s32.totalorder %s28_s19, %s4380_s29  ;;  %p4386_p7 = scmp.lt.s32.totalorder %s4380_s29, %s4380_s29 }
  0x2f   :  { %p4387_p8 = por %p4386_p7, %p4385_p6 }
  0x31   :  { %p4388_p9 = pnand %p4387_p8, %p4381_p5 }
  0x33   :  { %4391 = shalt.err (!%p4388_p9)
}
  0x34   :  { %s4473_s5 = smov 128   ;;  %s4474_s23 = smov 8  }
  0x35   :  { %33 = dma.hbm_to_vmem [thread:$0]  %s5158_s0, 512, %s28_s19, [#allocation3], %s4473_s5, %s4473_s5, %s4474_s23  }
  0x36   :  { %s4475_s15 = smov [#allocation7]   ;;  %s4476_s26 = smov [#allocation10]  }
  0x37   :  { %s53_s1 = sshll.u32 %s4475_s15, 4  ;;  %s81_s16 = sshll.u32 %s4476_s26, 4  ;;  %s54_s1 = int_to_ptr.vmem [resolvable:$true] %s53_s1  ;;  %s82_s16 = int_to_ptr.vmem [resolvable:$true] %s81_s16 }
  0x38   :  { %s4392_s20 = scalar_lea.hbm %s5161_s3, 2048 }
  0x39   :  { %p4393_p10 = scmp.ne.s32.totalorder %s5161_s3, %s4392_s20  ;;  %p4396_p11 = scmp.lt.u32.totalorder %s4392_s20, %s5161_s3 }
  0x3b   :  { %p4398_p12 = pnand %p4396_p11, %p4393_p10 }
  0x3d   :  { %4401 = shalt.err (!%p4398_p12)
}
  0x3e   :  { %s4402_s0 = scalar_lea.vmem %s54_s1, 2048  ;;  %p4407_p0 = scmp.lt.s32.totalorder %s54_s1, %s54_s1 }
  0x3f   :  { %p4403_p13 = scmp.ne.s32.totalorder %s54_s1, %s4402_s0  ;;  %p4408_p1 = scmp.lt.s32.totalorder %s4402_s0, %s4402_s0 }
  0x41   :  { %p4409_p2 = por %p4408_p1, %p4407_p0 }
  0x43   :  { %p4410_p3 = pnand %p4409_p2, %p4403_p13 }
  0x45   :  { %4413 = shalt.err (!%p4410_p3)
}
  0x46   :  { %59 = dma.hbm_to_vmem [thread:$0]  %s5161_s3, 2048, %s54_s1, [#allocation6], %s4473_s5, %s4473_s5, %s4474_s23  }
  0x47   :  { %s4414_s30 = scalar_lea.hbm %s5165_s7, 4096 }
  0x48   :  { %p4415_p4 = scmp.ne.s32.totalorder %s5165_s7, %s4414_s30  ;;  %p4418_p5 = scmp.lt.u32.totalorder %s4414_s30, %s5165_s7 }
  0x4a   :  { %p4420_p6 = pnand %p4418_p5, %p4415_p4 }
  0x4c   :  { %4423 = shalt.err (!%p4420_p6)
}
  0x4d   :  { %s4424_s18 = scalar_lea.vmem %s82_s16, 4096  ;;  %p4429_p8 = scmp.lt.s32.totalorder %s82_s16, %s82_s16 }
  0x4e   :  { %p4425_p7 = scmp.ne.s32.totalorder %s82_s16, %s4424_s18  ;;  %p4430_p9 = scmp.lt.s32.totalorder %s4424_s18, %s4424_s18 }
  0x50   :  { %p4431_p10 = por %p4430_p9, %p4429_p8 }
  0x52   :  { %p4432_p11 = pnand %p4431_p10, %p4425_p7 }
  0x54   :  { %4435 = shalt.err (!%p4432_p11)
}
  0x55   :  { %87 = dma.hbm_to_vmem [thread:$0]  %s5165_s7, 4096, %s82_s16, [#allocation9], %s4473_s5, %s4473_s5, %s4474_s23  }
  0x56   :  { %4458 = dma.done.wait [#allocation3], 512  }
  0x57   :  { %4459 = vsyncadd [#allocation3], 4294966784 }
  0x58   :  { %4460 = dma.done.wait [#allocation6], 8192  }
  0x59   :  { %4461 = vsyncadd [#allocation6], 4294959104 }
  0x5a   :  { %4462 = dma.done.wait [#allocation9], 8192  }
  0x5b   :  { %4463 = vsyncadd [#allocation9], 4294959104  ;;  %v4477_v0 = vmov 0.0   ;;  %v118_v1 = vld [vmem:[#allocation5 + $0x8] sm:$0xff]  ;;  %v121_v2 = vld [vmem:[#allocation5 + $0x20] sm:$0xff]  ;;  %vm4478_vm0 = vmmov 0  }
  0x5c   :  { %246 = vmatprep.mubr.f32.mxu0 %v4477_v0  ;;  %v117_v3 = vld [vmem:[#allocation5] sm:$0xff]  ;;  %v4019_v4 = vpack.c.bf16 %v121_v2, %v118_v1  ;;  %v120_v5 = vld [vmem:[#allocation5 + $0x18] sm:$0xff]  ;;  %v127_v7 = vld [vmem:[#allocation5 + $0x50] sm:$0xff]  ;;  %vm356_vm1 = vcmask 261120   ;;  %s4479_s20 = smov 64   ;;  %s4480_s21 = smov 96  }
  0x5d   :  { %v124_v6 = vld [vmem:[#allocation5 + $0x38] sm:$0xff]  ;;  %v4021_v8 = vpack.c.bf16 %v120_v5, %v117_v3  ;;  %v123_v10 = vld [vmem:[#allocation5 + $0x30] sm:$0xff]  ;;  %v126_v11 = vld [vmem:[#allocation5 + $0x48] sm:$0xff]  ;;  %vm433_vm2 = vcmask 64512   ;;  %vm1027_vm3 = vcmask 523264   ;;  %vm1029_vm4 = vcmask 785408  }
  0x5e   :  { %v4023_v9 = vpack.c.bf16 %v127_v7, %v124_v6  ;;  %v130_v12 = vld [vmem:[#allocation5 + $0x68] sm:$0xff]  ;;  %4020 = vmatprep.subr.bf16.mxu0 %v4019_v4  ;;  %v133_v13 = vld [vmem:[#allocation5 + $0x80] sm:$0xff]  ;;  %v4025_v14 = vpack.c.bf16 %v126_v11, %v123_v10  ;;  %v132_v17 = vld [vmem:[#allocation5 + $0x78] sm:$0xff] }
  0x5f   :  { %4022 = vmatpush1.bf16.msra.mxu0 %v4021_v8  ;;  %v4027_v15 = vpack.c.bf16 %v133_v13, %v130_v12  ;;  %v129_v16 = vld [vmem:[#allocation5 + $0x60] sm:$0xff]  ;;  %v136_v18 = vld [vmem:[#allocation5 + $0x98] sm:$0xff]  ;;  %v139_v19 = vld [vmem:[#allocation5 + $0xb0] sm:$0xff] }
  0x60   :  { %4024 = vmatprep.subr.bf16.mxu0 %v4023_v9  ;;  %v4029_v20 = vpack.c.bf16 %v132_v17, %v129_v16  ;;  %v4031_v21 = vpack.c.bf16 %v139_v19, %v136_v18  ;;  %v135_v22 = vld [vmem:[#allocation5 + $0x90] sm:$0xff]  ;;  %v138_v23 = vld [vmem:[#allocation5 + $0xa8] sm:$0xff]  ;;  %v145_v25 = vld [vmem:[#allocation5 + $0xe0] sm:$0xff] }
  0x61   :  { %v142_v24 = vld [vmem:[#allocation5 + $0xc8] sm:$0xff]  ;;  %v4623_v26 = vld [vmem:[#allocation2] sm:$0xff]  ;;  %v4033_v28 = vpack.c.bf16 %v138_v23, %v135_v22  ;;  %v119_v29 = vld [vmem:[#allocation5 + $0x10] sm:$0xff] }
  0x62   :  { %v141_v27 = vld [vmem:[#allocation5 + $0xc0] sm:$0xff]  ;;  %3815 = vmatprep.mubr.f32.mxu1 %v4623_v26  ;;  %v122_v30 = vld [vmem:[#allocation5 + $0x28] sm:$0xff]  ;;  %v4035_v32 = vpack.c.bf16 %v145_v25, %v142_v24  ;;  %v144_v33 = vld [vmem:[#allocation5 + $0xd8] sm:$0xff] }
  0x63   :  { %4026 = vmatpush1.bf16.msra.mxu0 %v4025_v14  ;;  %v125_v31 = vld [vmem:[#allocation5 + $0x40] sm:$0xff]  ;;  %v148_v34 = vld [vmem:[#allocation5 + $0xf8] sm:$0xff]  ;;  %v4051_v35 = vpack.c.bf16 %v122_v30, %v119_v29  ;;  %v151_v37 = vld [vmem:[#allocation5 + $0x110] sm:$0xff]  ;;  %v4037_v41 = vpack.c.bf16 %v144_v33, %v141_v27  ;;  %v167_v14 = vlaneseq }
  0x64   :  { %4028 = vmatprep.subr.bf16.mxu0 %v4027_v15  ;;  %v128_v36 = vld [vmem:[#allocation5 + $0x58] sm:$0xff]  ;;  %v131_v39 = vld [vmem:[#allocation5 + $0x70] sm:$0xff]  ;;  %v134_v40 = vld [vmem:[#allocation5 + $0x88] sm:$0xff]  ;;  %v4039_v42 = vpack.c.bf16 %v151_v37, %v148_v34 }
  0x65   :  { %v4055_v38 = vpack.c.bf16 %v128_v36, %v125_v31  ;;  %4052 = vmatprep.subr.bf16.mxu1 %v4051_v35  ;;  %v147_v43 = vld [vmem:[#allocation5 + $0xf0] sm:$0xff]  ;;  %v150_v44 = vld [vmem:[#allocation5 + $0x108] sm:$0xff]  ;;  %v4059_v46 = vpack.c.bf16 %v134_v40, %v131_v39  ;;  %v157_v47 = vld [vmem:[#allocation5 + $0x140] sm:$0xff]  ;;  %v4636_v15 = vshrl.u32 %v167_v14, 7 }
  0x66   :  { %4054 = vmatpush3.bf16.msra.mxu1 %v4051_v35  ;;  %v154_v45 = vld [vmem:[#allocation5 + $0x128] sm:$0xff]  ;;  %v137_v48 = vld [vmem:[#allocation5 + $0xa0] sm:$0xff]  ;;  %v140_v49 = vld [vmem:[#allocation5 + $0xb8] sm:$0xff]  ;;  %v4041_v50 = vpack.c.bf16 %v150_v44, %v147_v43 }
  0x67   :  { %4030 = vmatpush1.bf16.msra.mxu0 %v4029_v20  ;;  %4056 = vmatprep.subr.bf16.mxu1 %v4055_v38  ;;  %v4043_v51 = vpack.c.bf16 %v157_v47, %v154_v45  ;;  %v153_v52 = vld [vmem:[#allocation5 + $0x120] sm:$0xff]  ;;  %v156_v53 = vld [vmem:[#allocation5 + $0x138] sm:$0xff]  ;;  %v4063_v55 = vpack.c.bf16 %v140_v49, %v137_v48  ;;  %v163_v56 = vld [vmem:[#allocation5 + $0x170] sm:$0xff]  ;;  %v173_v16 = vsub.s32 1, %v4636_v15  ;;  %v169_v18 = vsub.s32 0, %v4636_v15 }
  0x68   :  { %4032 = vmatprep.subr.bf16.mxu0 %v4031_v21  ;;  %v160_v54 = vld [vmem:[#allocation5 + $0x158] sm:$0xff]  ;;  %v143_v57 = vld [vmem:[#allocation5 + $0xd0] sm:$0xff]  ;;  %v146_v58 = vld [vmem:[#allocation5 + $0xe8] sm:$0xff]  ;;  %v4045_v59 = vpack.c.bf16 %v156_v53, %v153_v52  ;;  %v177_v37 = vsub.s32 2, %v4636_v15 }
  0x69   :  { %v4047_v60 = vpack.c.bf16 %v163_v56, %v160_v54  ;;  %v159_v61 = vld [vmem:[#allocation5 + $0x150] sm:$0xff]  ;;  %v162_v62 = vld [vmem:[#allocation5 + $0x168] sm:$0xff]  ;;  %v4067_v63 = vpack.c.bf16 %v146_v58, %v143_v57  ;;  %v149_v1 = vld [vmem:[#allocation5 + $0x100] sm:$0xff] }
  0x6a   :  { %4058 = vmatpush3.bf16.msra.mxu1 %v4055_v38  ;;  %v152_v2 = vld [vmem:[#allocation5 + $0x118] sm:$0xff]  ;;  %v4049_v3 = vpack.c.bf16 %v162_v62, %v159_v61  ;;  %v155_v5 = vld [vmem:[#allocation5 + $0x130] sm:$0xff]  ;;  %v158_v6 = vld [vmem:[#allocation5 + $0x148] sm:$0xff] }
  0x6b   :  { %4034 = vmatpush1.bf16.msra.mxu0 %v4033_v28  ;;  %4060 = vmatprep.subr.bf16.mxu1 %v4059_v46  ;;  %v4071_v4 = vpack.c.bf16 %v152_v2, %v149_v1  ;;  %v4075_v7 = vpack.c.bf16 %v158_v6, %v155_v5  ;;  %v161_v8 = vld [vmem:[#allocation5 + $0x160] sm:$0xff]  ;;  %v164_v9 = vld [vmem:[#allocation5 + $0x178] sm:$0xff]  ;;  %v114_v10 = vld [vmem:[#allocation2 + $0x8] sm:$0xff] }
  0x6c   :  { %4036 = vmatprep.subr.bf16.mxu0 %v4035_v32  ;;  %v4079_v11 = vpack.c.bf16 %v164_v9, %v161_v8  ;;  %v115_v12 = vld [vmem:[#allocation2 + $0x10] sm:$0xff]  ;;  %v116_v13 = vld [vmem:[#allocation2 + $0x18] sm:$0xff]  ;;  %v165_v17 = vld [vmem:[%s5160_s2] sm:$0x7]  ;;  %s4481_s2 = smov 32  }
  0x6d   :  { %v174_v19 = vrot.slane %v165_v17, %v173_v16  ;;  %v170_v22 = vrot.slane %v165_v17, %v169_v18  ;;  %v178_v40 = vrot.slane %v165_v17, %v177_v37 }
  0x6e   :  { %4062 = vmatpush3.bf16.msra.mxu1 %v4059_v46 }
  0x6f   :  { %4038 = vmatpush1.bf16.msra.mxu0 %v4037_v41  ;;  %4064 = vmatprep.subr.bf16.mxu1 %v4063_v55 }
  0x70   :  { %4040 = vmatprep.subr.bf16.mxu0 %v4039_v42 }
  0x72   :  { %4066 = vmatpush3.bf16.msra.mxu1 %v4063_v55 }
  0x73   :  { %4042 = vmatpush1.bf16.msra.mxu0 %v4041_v50  ;;  %4068 = vmatprep.subr.bf16.mxu1 %v4067_v63 }
  0x74   :  { %4044 = vmatprep.subr.bf16.mxu0 %v4043_v51 }
  0x76   :  { %4070 = vmatpush3.bf16.msra.mxu1 %v4067_v63 }
  0x77   :  { %4046 = vmatpush1.bf16.msra.mxu0 %v4045_v59  ;;  %4072 = vmatprep.subr.bf16.mxu1 %v4071_v4 }
  0x78   :  { %4048 = vmatprep.subr.bf16.mxu0 %v4047_v60 }
  0x7a   :  { %4074 = vmatpush3.bf16.msra.mxu1 %v4071_v4 }
  0x7b   :  { %4050 = vmatpush1.bf16.msra.mxu0 %v4049_v3  ;;  %4076 = vmatprep.subr.bf16.mxu1 %v4075_v7 }
  0x7c   :  { %3831 = vmatprep.subr.mxu0 %v4477_v0 }
  0x7e   :  { %247 = vmatmul.mubr.f32.vlgmr.msra.gmra.mrb[0].mxu0 %v4623_v26  ;;  %4078 = vmatpush3.bf16.msra.mxu1 %v4075_v7 }
  0x7f   :  { %252 = vmatprep.mubr.f32.mxu0 %v4477_v0  ;;  %4080 = vmatprep.subr.bf16.mxu1 %v4079_v11 }
  0x82   :  { %253 = vmatmul.mubr.f32.gmra.mrb[2].mxu0 %v114_v10  ;;  %4082 = vmatpush3.bf16.msra.mxu1 %v4079_v11 }
  0x83   :  { %258 = vmatprep.mubr.f32.mxu0 %v4477_v0  ;;  %3821 = vmatprep.subr.mxu1 %v4477_v0 }
  0x85   :  { %3816 = vmatmul.mubr.f32.vlgmr.msra.gmra.mrb[0].mxu1 %v114_v10 }
  0x86   :  { %259 = vmatmul.mubr.f32.gmra.mrb[4].mxu0 %v115_v12  ;;  %3818 = vmatprep.mubr.f32.mxu1 %v115_v12 }
  0x87   :  { %264 = vmatprep.mubr.f32.mxu0 %v4477_v0 }
  0x89   :  { %3819 = vmatmul.mubr.f32.gmra.mrb[2].mxu1 %v116_v13 }
  0x8a   :  { %265 = vmatmul.mubr.f32.gmra.mrb[6].mxu0 %v116_v13  ;;  %3823 = vmatprep.mubr.msk.f32.mxu1 %vm4478_vm0, %v4477_v0 }
  0x8b   :  { %3833 = vmatprep.mubr.msk.f32.mxu0 %vm4478_vm0, %v4477_v0 }
 0x151   :  { %v248_v20 = vpop.f32.mrb[0].mxu0 }
 0x152   :  { %v250_v21 = vpop.f32.mrb[1].mxu0  ;;  %v249_v26 = vadd.f32 %v248_v20, %v170_v22 }
 0x153   :  { %v251_v23 = vadd.f32 %v250_v21, %v174_v19 }
 0x155   :  { %686 = vrot.lane.b32.xlu1 %v251_v23, %s4479_s20  ;;  %520 = vrot.lane.b32.xlu0 %v251_v23, %s4480_s21  ;;  %v254_v24 = vpop.f32.mrb[2].mxu0 }
 0x156   :  { %3822 = vmatpush3.xpose.msk.msra.mxu1 %vm356_vm1, %v251_v23  ;;  %v256_v25 = vpop.f32.mrb[3].mxu0  ;;  %v4657_v29 = vadd.f32 %v254_v24, %v170_v22 }
 0x157   :  { %3826 = vmatprep.subr.mxu1 %v4477_v0  ;;  %v257_v31 = vadd.f32 %v256_v25, %v174_v19 }
 0x158   :  { %v3817_v38 = vpop.f32.mrb[0].mxu1 }
 0x159   :  { %3824 = vmatmul.mubr.msk.f32.vlgmr.msra.gmra.mrb[4].mxu1 %vm356_vm1, %v249_v26  ;;  %684 = vrot.lane.b32.xlu1 %v249_v26, %s4479_s20  ;;  %v260_v27 = vpop.f32.mrb[4].mxu0  ;;  %v337_v39 = vpop.f32.mrb[1].mxu1  ;;  %v4704_v45 = vadd.f32 %v3817_v38, %v178_v40 }
 0x15a   :  { %518 = vrot.lane.b32.xlu0 %v249_v26, %s4480_s21  ;;  %v262_v28 = vpop.f32.mrb[5].mxu0  ;;  %3828 = vmatprep.mubr.msk.f32.mxu1 %vm4478_vm0, %v4477_v0  ;;  %v4668_v33 = vadd.f32 %v260_v27, %v170_v22  ;;  %v338_v41 = vadd.f32 %v337_v39, %v178_v40 }
 0x15b   :  { %v4671_v34 = vadd.f32 %v262_v28, %v174_v19 }
 0x15c   :  { %v3820_v42 = vpop.f32.mrb[2].mxu1  ;;  %3827 = vmatpush3.msra.mxu1 %v338_v41 }
 0x15d   :  { %849 = vrot.lane.b32.xlu1 %v249_v26, %s4481_s2  ;;  %v266_v30 = vpop.f32.mrb[6].mxu0  ;;  %v4702_v43 = vadd.f32 %v3820_v42, %v178_v40  ;;  %v347_v44 = vpop.f32.mrb[3].mxu1  ;;  %3836 = vmatprep.subr.mxu1 %v4477_v0 }
 0x15e   :  { %851 = vrot.lane.b32.xlu0 %v251_v23, %s4481_s2  ;;  %v268_v32 = vpop.f32.mrb[7].mxu0  ;;  %v4683_v35 = vadd.f32 %v266_v30, %v170_v22  ;;  %v4707_v46 = vadd.f32 %v347_v44, %v178_v40 }
 0x15f   :  { %v4687_v36 = vadd.f32 %v268_v32, %v174_v19 }
 0x161   :  { %1191 = vrot.lane.b32.xlu1 %v4657_v29, %s4480_s21 }
 0x162   :  { %1193 = vrot.lane.b32.xlu0 %v257_v31, %s4480_s21 }
 0x165   :  { %1357 = vrot.lane.b32.xlu1 %v4657_v29, %s4479_s20 }
 0x166   :  { %1359 = vrot.lane.b32.xlu0 %v257_v31, %s4479_s20 }
 0x169   :  { %1522 = vrot.lane.b32.xlu1 %v4657_v29, %s4481_s2 }
 0x16a   :  { %1524 = vrot.lane.b32.xlu0 %v257_v31, %s4481_s2 }
 0x16d   :  { %1862 = vrot.lane.b32.xlu1 %v4668_v33, %s4480_s21 }
 0x16e   :  { %1864 = vrot.lane.b32.xlu0 %v4671_v34, %s4480_s21 }
 0x171   :  { %2028 = vrot.lane.b32.xlu1 %v4668_v33, %s4479_s20 }
 0x172   :  { %2030 = vrot.lane.b32.xlu0 %v4671_v34, %s4479_s20 }
 0x175   :  { %2193 = vrot.lane.b32.xlu1 %v4668_v33, %s4481_s2 }
 0x176   :  { %2195 = vrot.lane.b32.xlu0 %v4671_v34, %s4481_s2 }
 0x179   :  { %2533 = vrot.lane.b32.xlu1 %v4683_v35, %s4480_s21 }
 0x17a   :  { %2535 = vrot.lane.b32.xlu0 %v4687_v36, %s4480_s21 }
 0x17d   :  { %2699 = vrot.lane.b32.xlu1 %v4683_v35, %s4479_s20 }
 0x17e   :  { %2701 = vrot.lane.b32.xlu0 %v4687_v36, %s4479_s20 }
 0x181   :  { %2864 = vrot.lane.b32.xlu1 %v4683_v35, %s4481_s2 }
 0x182   :  { %2866 = vrot.lane.b32.xlu0 %v4687_v36, %s4481_s2 }
 0x185   :  { %608 = vrot.lane.b32.xlu1 %v338_v41, %s4480_s21 }
 0x186   :  { %773 = vrot.lane.b32.xlu0 %v338_v41, %s4479_s20 }
 0x189   :  { %1281 = vrot.lane.b32.xlu1 %v4704_v45, %s4480_s21 }
 0x18a   :  { %938 = vrot.lane.b32.xlu0 %v338_v41, %s4481_s2 }
 0x1c7   :  { %v687_v47 = vpop.permute.xlu1 %686  ;;  %v521_v48 = vpop.permute.xlu0 %520 }
 0x1c8   :  { %3832 = vmatpush3.xpose.msk.msra.mxu0 %vm356_vm1, %v521_v48 }
 0x1c9   :  { %3841 = vmatprep.subr.mxu0 %v4477_v0 }
 0x1cb   :  { %v685_v49 = vpop.permute.xlu1 %684 }
 0x1cc   :  { %v519_v50 = vpop.permute.xlu0 %518 }
 0x1cd   :  { %3834 = vmatmul.mubr.msk.f32.vlgmr.msra.gmra.mrb[8].mxu0 %vm356_vm1, %v519_v50 }
 0x1ce   :  { %3842 = vmatpush3.xpose.msk.msra.mxu0 %vm356_vm1, %v687_v47  ;;  %3843 = vmatprep.mubr.msk.f32.mxu0 %vm4478_vm0, %v4477_v0 }
 0x1cf   :  { %3851 = vmatprep.subr.mxu0 %v4477_v0  ;;  %v850_v51 = vpop.permute.xlu1 %849 }
 0x1d0   :  { %v852_v52 = vpop.permute.xlu0 %851 }
 0x1d1   :  { %3844 = vmatmul.mubr.msk.f32.vlgmr.msra.gmra.mrb[10].mxu0 %vm356_vm1, %v685_v49 }
 0x1d2   :  { %3852 = vmatpush3.xpose.msk.msra.mxu0 %vm356_vm1, %v852_v52  ;;  %3853 = vmatprep.mubr.msk.f32.mxu0 %vm4478_vm0, %v4477_v0 }
 0x1d3   :  { %3861 = vmatprep.subr.mxu0 %v4477_v0  ;;  %v1192_v54 = vpop.permute.xlu1 %1191 }
 0x1d4   :  { %v1194_v53 = vpop.permute.xlu0 %1193 }
 0x1d5   :  { %3854 = vmatmul.mubr.msk.f32.vlgmr.msra.gmra.mrb[12].mxu0 %vm356_vm1, %v850_v51 }
 0x1d6   :  { %3862 = vmatpush3.xpose.msk.msra.mxu0 %vm356_vm1, %v257_v31  ;;  %3863 = vmatprep.mubr.msk.f32.mxu0 %vm4478_vm0, %v4477_v0 }
 0x1d7   :  { %3871 = vmatprep.subr.mxu0 %v4477_v0  ;;  %v1358_v56 = vpop.permute.xlu1 %1357 }
 0x1d8   :  { %v1360_v55 = vpop.permute.xlu0 %1359 }
 0x1d9   :  { %3864 = vmatmul.mubr.msk.f32.vlgmr.msra.gmra.mrb[14].mxu0 %vm356_vm1, %v4657_v29 }
 0x1da   :  { %3872 = vmatpush3.xpose.msk.msra.mxu0 %vm356_vm1, %v1194_v53  ;;  %3873 = vmatprep.mubr.msk.f32.mxu0 %vm4478_vm0, %v4477_v0 }
 0x1db   :  { %3881 = vmatprep.subr.mxu0 %v4477_v0  ;;  %v1523_v58 = vpop.permute.xlu1 %1522 }
 0x1dc   :  { %v1525_v57 = vpop.permute.xlu0 %1524 }
 0x1dd   :  { %3874 = vmatmul.mubr.msk.f32.vlgmr.msra.gmra.mrb[16].mxu0 %vm356_vm1, %v1192_v54 }
 0x1de   :  { %3882 = vmatpush3.xpose.msk.msra.mxu0 %vm356_vm1, %v1360_v55  ;;  %3883 = vmatprep.mubr.msk.f32.mxu0 %vm4478_vm0, %v4477_v0 }
 0x1df   :  { %3891 = vmatprep.subr.mxu0 %v4477_v0  ;;  %v1863_v60 = vpop.permute.xlu1 %1862 }
 0x1e0   :  { %v1865_v59 = vpop.permute.xlu0 %1864 }
 0x1e1   :  { %3884 = vmatmul.mubr.msk.f32.vlgmr.msra.gmra.mrb[18].mxu0 %vm356_vm1, %v1358_v56 }
 0x1e2   :  { %3892 = vmatpush3.xpose.msk.msra.mxu0 %vm356_vm1, %v1525_v57  ;;  %3893 = vmatprep.mubr.msk.f32.mxu0 %vm4478_vm0, %v4477_v0 }
 0x1e3   :  { %3901 = vmatprep.subr.mxu0 %v4477_v0  ;;  %v2029_v62 = vpop.permute.xlu1 %2028 }
 0x1e4   :  { %v2031_v61 = vpop.permute.xlu0 %2030 }
 0x1e5   :  { %3894 = vmatmul.mubr.msk.f32.vlgmr.msra.gmra.mrb[20].mxu0 %vm356_vm1, %v1523_v58 }
 0x1e6   :  { %3902 = vmatpush3.xpose.msk.msra.mxu0 %vm356_vm1, %v4671_v34  ;;  %3903 = vmatprep.mubr.msk.f32.mxu0 %vm4478_vm0, %v4477_v0 }
 0x1e7   :  { %3911 = vmatprep.subr.mxu0 %v4477_v0  ;;  %v2194_v1 = vpop.permute.xlu1 %2193 }
 0x1e8   :  { %v2196_v63 = vpop.permute.xlu0 %2195 }
 0x1e9   :  { %3904 = vmatmul.mubr.msk.f32.vlgmr.msra.gmra.mrb[22].mxu0 %vm356_vm1, %v4668_v33 }
 0x1ea   :  { %3912 = vmatpush3.xpose.msk.msra.mxu0 %vm356_vm1, %v1865_v59  ;;  %3913 = vmatprep.mubr.msk.f32.mxu0 %vm4478_vm0, %v4477_v0 }
 0x1eb   :  { %3921 = vmatprep.subr.mxu0 %v4477_v0  ;;  %v2534_v3 = vpop.permute.xlu1 %2533 }
 0x1ec   :  { %v2536_v2 = vpop.permute.xlu0 %2535 }
 0x1ed   :  { %3914 = vmatmul.mubr.msk.f32.vlgmr.msra.gmra.mrb[24].mxu0 %vm356_vm1, %v1863_v60 }
 0x1ee   :  { %3922 = vmatpush3.xpose.msk.msra.mxu0 %vm356_vm1, %v2031_v61  ;;  %3923 = vmatprep.mubr.msk.f32.mxu0 %vm4478_vm0, %v4477_v0 }
 0x1ef   :  { %3931 = vmatprep.subr.mxu0 %v4477_v0  ;;  %v2700_v5 = vpop.permute.xlu1 %2699 }
 0x1f0   :  { %v2702_v4 = vpop.permute.xlu0 %2701 }
 0x1f1   :  { %3924 = vmatmul.mubr.msk.f32.vlgmr.msra.gmra.mrb[26].mxu0 %vm356_vm1, %v2029_v62 }
 0x1f2   :  { %3932 = vmatpush3.xpose.msk.msra.mxu0 %vm356_vm1, %v2196_v63  ;;  %3933 = vmatprep.mubr.msk.f32.mxu0 %vm4478_vm0, %v4477_v0 }
 0x1f3   :  { %3941 = vmatprep.subr.mxu0 %v4477_v0  ;;  %v2865_v7 = vpop.permute.xlu1 %2864 }
 0x1f4   :  { %v2867_v6 = vpop.permute.xlu0 %2866 }
 0x1f5   :  { %3934 = vmatmul.mubr.msk.f32.vlgmr.msra.gmra.mrb[28].mxu0 %vm356_vm1, %v2194_v1 }
 0x1f6   :  { %3942 = vmatpush3.xpose.msk.msra.mxu0 %vm356_vm1, %v4687_v36  ;;  %3943 = vmatprep.mubr.msk.f32.mxu0 %vm4478_vm0, %v4477_v0 }
 0x1f7   :  { %3951 = vmatprep.subr.mxu0 %v4477_v0 }
 0x1f8   :  { %v4808_v26 = vpop.permute.xlu0 %773 }
 0x1f9   :  { %3944 = vmatmul.mubr.msk.f32.vlgmr.msra.gmra.mrb[30].mxu0 %vm356_vm1, %v4683_v35 }
 0x1fa   :  { %3952 = vmatpush3.xpose.msk.msra.mxu0 %vm356_vm1, %v2536_v2  ;;  %3953 = vmatprep.mubr.msk.f32.mxu0 %vm4478_vm0, %v4477_v0 }
 0x1fb   :  { %3961 = vmatprep.subr.mxu0 %v4477_v0 }
 0x1fc   :  { %v4818_v33 = vpop.permute.xlu0 %938 }
 0x1fd   :  { %3954 = vmatmul.mubr.msk.f32.vlgmr.msra.gmra.mrb[32].mxu0 %vm356_vm1, %v2534_v3 }
 0x1fe   :  { %3962 = vmatpush3.xpose.msk.msra.mxu0 %vm356_vm1, %v2702_v4  ;;  %3963 = vmatprep.mubr.msk.f32.mxu0 %vm4478_vm0, %v4477_v0 }
 0x1ff   :  { %3971 = vmatprep.subr.mxu0 %v4477_v0 }
 0x201   :  { %3964 = vmatmul.mubr.msk.f32.vlgmr.msra.gmra.mrb[34].mxu0 %vm356_vm1, %v2700_v5 }
 0x202   :  { %3972 = vmatpush3.xpose.msk.msra.mxu0 %vm356_vm1, %v2867_v6  ;;  %3973 = vmatprep.mubr.msk.f32.mxu0 %vm4478_vm0, %v4477_v0  ;;  %v609_v6 = vpop.permute.xlu1 %608 }
 0x205   :  { %3974 = vmatmul.mubr.msk.f32.vlgmr.msra.gmra.mrb[36].mxu0 %vm356_vm1, %v2865_v7 }
 0x206   :  { %v4864_v7 = vpop.permute.xlu1 %1281 }
 0x22c   :  { %v429_v8 = vpop.f32.mrb[4].mxu1 }
 0x22d   :  { %v3825_v9 = vpop.f32.mrb[5].mxu1  ;;  %v434_v10 = vsel %vm433_vm2, %v429_v8, -inf }
 0x22e   :  { %435 = vmax.xlane.f32.xlu0 %v434_v10 }
 0x2a0   :  { %v4792_v11 = vpop.f32.mrb[8].mxu0 }
 0x2a1   :  { %v3835_v12 = vpop.f32.mrb[9].mxu0  ;;  %v596_v13 = vsel %vm433_vm2, %v4792_v11, -inf }
 0x2a2   :  { %597 = vmax.xlane.f32.xlu1 %v596_v13 }
 0x2a4   :  { %v4796_v14 = vpop.f32.mrb[10].mxu0 }
 0x2a5   :  { %v3845_v17 = vpop.f32.mrb[11].mxu0  ;;  %v762_v19 = vsel %vm433_vm2, %v4796_v14, -inf }
 0x2a6   :  { %763 = vmax.xlane.f32.xlu0 %v762_v19 }
 0x2a8   :  { %v4800_v20 = vpop.f32.mrb[12].mxu0 }
 0x2a9   :  { %v3855_v21 = vpop.f32.mrb[13].mxu0  ;;  %v927_v22 = vsel %vm433_vm2, %v4800_v20, -inf }
 0x2aa   :  { %928 = vmax.xlane.f32.xlu0 %v927_v22 }
 0x2ac   :  { %v4804_v23 = vpop.f32.mrb[14].mxu0 }
 0x2ad   :  { %v3865_v24 = vpop.f32.mrb[15].mxu0  ;;  %v1107_v25 = vsel %vm433_vm2, %v4804_v23, -inf }
 0x2ae   :  { %1108 = vmax.xlane.f32.xlu1 %v1107_v25 }
 0x2b0   :  { %v4810_v27 = vpop.f32.mrb[16].mxu0 }
 0x2b1   :  { %v1269_v28 = vsel %vm433_vm2, %v4810_v27, -inf  ;;  %v3875_v29 = vpop.f32.mrb[17].mxu0 }
 0x2b2   :  { %1270 = vmax.xlane.f32.xlu0 %v1269_v28 }
 0x2b4   :  { %v4814_v30 = vpop.f32.mrb[18].mxu0 }
 0x2b5   :  { %v1435_v31 = vsel %vm433_vm2, %v4814_v30, -inf  ;;  %v3885_v32 = vpop.f32.mrb[19].mxu0 }
 0x2b6   :  { %1436 = vmax.xlane.f32.xlu1 %v1435_v31 }
 0x2b8   :  { %v4820_v34 = vpop.f32.mrb[20].mxu0 }
 0x2b9   :  { %v3895_v35 = vpop.f32.mrb[21].mxu0  ;;  %v1600_v1 = vsel %vm433_vm2, %v4820_v34, -inf }
 0x2bb   :  { %v436_v36 = vpop.xlane.xlu0 %435 }
 0x2bc   :  { %v437_v37 = vsub.f32 %v429_v8, %v436_v36  ;;  %v4822_v38 = vpop.f32.mrb[22].mxu0 }
 0x2bd   :  { %v3905_v39 = vpop.f32.mrb[23].mxu0  ;;  %v1778_v40 = vsel %vm433_vm2, %v4822_v38, -inf }
 0x2be   :  { %v438_v41 = vmul.f32 1.442695, %v437_v37  ;;  %1779 = vmax.xlane.f32.xlu1 %v1778_v40 }
 0x2c0   :  { %4242 = vpow2.f32 %v438_v41  ;;  %v4826_v42 = vpop.f32.mrb[24].mxu0 }
 0x2c1   :  { %v3915_v44 = vpop.f32.mrb[25].mxu0  ;;  %v1940_v2 = vsel %vm433_vm2, %v4826_v42, -inf }
 0x2c4   :  { %v4828_v47 = vpop.f32.mrb[26].mxu0 }
 0x2c5   :  { %v2106_v48 = vsel %vm433_vm2, %v4828_v47, -inf  ;;  %v3925_v49 = vpop.f32.mrb[27].mxu0 }
 0x2c6   :  { %2107 = vmax.xlane.f32.xlu1 %v2106_v48 }
 0x2c8   :  { %1446 = vrot.lane.b32.xlu0 %v4704_v45, %s4479_s20  ;;  %v4834_v50 = vpop.f32.mrb[28].mxu0 }
 0x2c9   :  { %v3935_v51 = vpop.f32.mrb[29].mxu0  ;;  %v2271_v3 = vsel %vm433_vm2, %v4834_v50, -inf }
 0x2ca   :  { %v4836_v52 = vpop.eup %4242 }
 0x2cb   :  { %v440_v53 = vsel %vm433_vm2, %v4836_v52, 0.0 }
 0x2cc   :  { %v4840_v54 = vpop.f32.mrb[30].mxu0  ;;  %441 = vadd.xlane.f32.xlu1 %v440_v53 }
 0x2cd   :  { %v3945_v55 = vpop.f32.mrb[31].mxu0  ;;  %v2449_v56 = vsel %vm433_vm2, %v4840_v54, -inf }
 0x2d0   :  { %2450 = vmax.xlane.f32.xlu1 %v2449_v56  ;;  %v4844_v57 = vpop.f32.mrb[32].mxu0 }
 0x2d1   :  { %v3955_v58 = vpop.f32.mrb[33].mxu0  ;;  %v2611_v4 = vsel %vm433_vm2, %v4844_v57, -inf }
 0x2d4   :  { %v4846_v59 = vpop.f32.mrb[34].mxu0 }
 0x2d5   :  { %v2777_v60 = vsel %vm433_vm2, %v4846_v59, -inf  ;;  %v3965_v61 = vpop.f32.mrb[35].mxu0 }
 0x2d6   :  { %2778 = vmax.xlane.f32.xlu1 %v2777_v60 }
 0x2d8   :  { %v4850_v62 = vpop.f32.mrb[36].mxu0 }
 0x2d9   :  { %v3975_v63 = vpop.f32.mrb[37].mxu0  ;;  %v2942_v5 = vsel %vm433_vm2, %v4850_v62, -inf }
 0x2e7   :  { %1601 = vmax.xlane.f32.xlu0 %v1600_v1  ;;  %1952 = vrot.lane.b32.xlu1 %v4707_v46, %s4480_s21 }
 0x2eb   :  { %1941 = vmax.xlane.f32.xlu0 %v1940_v2 }
 0x2ef   :  { %2272 = vmax.xlane.f32.xlu0 %v2271_v3 }
 0x2f3   :  { %2612 = vmax.xlane.f32.xlu0 %v2611_v4 }
 0x2f7   :  { %2943 = vmax.xlane.f32.xlu0 %v2942_v5 }
 0x32f   :  { %v598_v8 = vpop.xlane.xlu1 %597 }
 0x330   :  { %v599_v9 = vsub.f32 %v4792_v11, %v598_v8 }
 0x332   :  { %v600_v10 = vmul.f32 1.442695, %v599_v9 }
 0x333   :  { %v764_v12 = vpop.xlane.xlu0 %763 }
 0x334   :  { %4244 = vpow2.f32 %v600_v10  ;;  %v765_v13 = vsub.f32 %v4796_v14, %v764_v12 }
 0x336   :  { %v766_v17 = vmul.f32 1.442695, %v765_v13 }
 0x337   :  { %v929_v40 = vpop.xlane.xlu0 %928 }
 0x338   :  { %4246 = vpow2.f32 %v766_v17  ;;  %v930_v41 = vsub.f32 %v4800_v20, %v929_v40 }
 0x33a   :  { %v931_v48 = vmul.f32 1.442695, %v930_v41 }
 0x33b   :  { %v1109_v19 = vpop.xlane.xlu1 %1108 }
 0x33c   :  { %v1110_v21 = vsub.f32 %v4804_v23, %v1109_v19 }
 0x33e   :  { %v4869_v22 = vpop.eup %4244  ;;  %v1111_v24 = vmul.f32 1.442695, %v1110_v21 }
 0x33f   :  { %v602_v25 = vsel %vm433_vm2, %v4869_v22, 0.0  ;;  %v1271_v44 = vpop.xlane.xlu0 %1270 }
 0x340   :  { %4248 = vpow2.f32 %v1111_v24  ;;  %603 = vadd.xlane.f32.xlu0 %v602_v25  ;;  %v1272_v49 = vsub.f32 %v4810_v27, %v1271_v44 }
 0x342   :  { %v4873_v28 = vpop.eup %4246  ;;  %v1273_v55 = vmul.f32 1.442695, %v1272_v49 }
 0x343   :  { %v1437_v11 = vpop.xlane.xlu1 %1436  ;;  %v768_v29 = vsel %vm433_vm2, %v4873_v28, 0.0  ;;  %v4895_v56 = vpop.permute.xlu0 %1446 }
 0x344   :  { %v1438_v14 = vsub.f32 %v4814_v30, %v1437_v11  ;;  %769 = vadd.xlane.f32.xlu1 %v768_v29 }
 0x346   :  { %v1439_v31 = vmul.f32 1.442695, %v1438_v14 }
 0x348   :  { %4250 = vpow2.f32 %v1439_v31 }
 0x34a   :  { %v4878_v23 = vpop.eup %4248 }
 0x34b   :  { %v1113_v32 = vsel %vm433_vm2, %v4878_v23, 0.0  ;;  %v1780_v35 = vpop.xlane.xlu1 %1779 }
 0x34c   :  { %1114 = vadd.xlane.f32.xlu1 %v1113_v32  ;;  %v1781_v27 = vsub.f32 %v4822_v38, %v1780_v35 }
 0x34e   :  { %v1782_v63 = vmul.f32 1.442695, %v1781_v27 }
 0x352   :  { %v4882_v36 = vpop.eup %4250 }
 0x353   :  { %v1441_v37 = vsel %vm433_vm2, %v4882_v36, 0.0  ;;  %v2108_v39 = vpop.xlane.xlu1 %2107 }
 0x354   :  { %1442 = vadd.xlane.f32.xlu1 %v1441_v37  ;;  %v2109_v1 = vsub.f32 %v4828_v47, %v2108_v39 }
 0x356   :  { %1611 = vrot.lane.b32.xlu0 %v4704_v45, %s4481_s2 }
 0x359   :  { %v442_v30 = vpop.xlane.xlu1 %441 }
 0x35a   :  { %4252 = vrcp.f32 %v442_v30 }
 0x35b   :  { %4254 = vpow2.f32 %v931_v48 }
 0x35c   :  { %4256 = vpow2.f32 %v1273_v55 }
 0x35d   :  { %v2451_v3 = vpop.xlane.xlu1 %2450 }
 0x35e   :  { %v2452_v8 = vsub.f32 %v4840_v54, %v2451_v3 }
 0x360   :  { %v2453_v12 = vmul.f32 1.442695, %v2452_v8 }
 0x364   :  { %v4253_v51 = vpop.eup %4252 }
 0x365   :  { %v444_v53 = vmul.f32 %v4253_v51, %v4836_v52  ;;  %v4897_v20 = vpop.eup %4254 }
 0x366   :  { %v933_v52 = vsel %vm433_vm2, %v4897_v20, 0.0  ;;  %v4902_v60 = vpop.eup %4256 }
 0x367   :  { %3829 = vmatmul.mubr.msk.f32.vlgmr.msra.gmra.mrb[6].mxu1 %vm433_vm2, %v444_v53  ;;  %v1275_v5 = vsel %vm433_vm2, %v4902_v60, 0.0 }
 0x368   :  { %3837 = vmatpush3.msra.mxu1 %v609_v6  ;;  %3838 = vmatprep.mubr.msk.f32.mxu1 %vm4478_vm0, %v4477_v0  ;;  %v2110_v6 = vmul.f32 1.442695, %v2109_v1 }
 0x369   :  { %3846 = vmatprep.subr.mxu1 %v4477_v0 }
 0x374   :  { %v1602_v58 = vpop.xlane.xlu0 %1601 }
 0x375   :  { %v1603_v61 = vsub.f32 %v4820_v34, %v1602_v58  ;;  %934 = vadd.xlane.f32.xlu0 %v933_v52  ;;  %v2779_v34 = vpop.xlane.xlu1 %2778 }
 0x376   :  { %v2780_v13 = vsub.f32 %v4846_v59, %v2779_v34 }
 0x377   :  { %v1604_v2 = vmul.f32 1.442695, %v1603_v61 }
 0x378   :  { %v1942_v4 = vpop.xlane.xlu0 %1941  ;;  %v2781_v24 = vmul.f32 1.442695, %v2780_v13 }
 0x379   :  { %4258 = vpow2.f32 %v1604_v2  ;;  %v1943_v38 = vsub.f32 %v4826_v42, %v1942_v4  ;;  %1276 = vadd.xlane.f32.xlu0 %v1275_v5  ;;  %v4956_v53 = vpop.permute.xlu1 %1952 }
 0x37a   :  { %4260 = vpow2.f32 %v1782_v63 }
 0x37b   :  { %v1944_v9 = vmul.f32 1.442695, %v1943_v38 }
 0x37c   :  { %v2273_v10 = vpop.xlane.xlu0 %2272 }
 0x37d   :  { %4262 = vpow2.f32 %v1944_v9  ;;  %v2274_v47 = vsub.f32 %v4834_v50, %v2273_v10 }
 0x37e   :  { %4264 = vpow2.f32 %v2110_v6 }
 0x37f   :  { %v2275_v17 = vmul.f32 1.442695, %v2274_v47 }
 0x380   :  { %v2613_v19 = vpop.xlane.xlu0 %2612 }
 0x381   :  { %4266 = vpow2.f32 %v2275_v17  ;;  %v2614_v42 = vsub.f32 %v4844_v57, %v2613_v19 }
 0x382   :  { %4268 = vpow2.f32 %v2453_v12 }
 0x383   :  { %v4913_v21 = vpop.eup %4258  ;;  %v2615_v54 = vmul.f32 1.442695, %v2614_v42 }
 0x384   :  { %v1606_v25 = vsel %vm433_vm2, %v4913_v21, 0.0  ;;  %v4917_v11 = vpop.eup %4260  ;;  %v2944_v44 = vpop.xlane.xlu0 %2943 }
 0x385   :  { %4270 = vpow2.f32 %v2615_v54  ;;  %1607 = vadd.xlane.f32.xlu0 %v1606_v25  ;;  %v1784_v59 = vsel %vm433_vm2, %v4917_v11, 0.0  ;;  %v2945_v48 = vsub.f32 %v4850_v62, %v2944_v44 }
 0x386   :  { %4272 = vpow2.f32 %v2781_v24 }
 0x387   :  { %v4919_v50 = vpop.eup %4262  ;;  %v2946_v49 = vmul.f32 1.442695, %v2945_v48 }
 0x388   :  { %v1946_v57 = vsel %vm433_vm2, %v4919_v50, 0.0  ;;  %v4925_v29 = vpop.eup %4264 }
 0x389   :  { %1785 = vadd.xlane.f32.xlu0 %v1784_v59  ;;  %1947 = vadd.xlane.f32.xlu1 %v1946_v57  ;;  %v2112_v31 = vsel %vm433_vm2, %v4925_v29, 0.0  ;;  %4274 = vpow2.f32 %v2946_v49 }
 0x38b   :  { %v4927_v14 = vpop.eup %4266 }
 0x38c   :  { %v2277_v32 = vsel %vm433_vm2, %v4927_v14, 0.0  ;;  %v4933_v35 = vpop.eup %4268 }
 0x38d   :  { %2113 = vadd.xlane.f32.xlu0 %v2112_v31  ;;  %2278 = vadd.xlane.f32.xlu1 %v2277_v32  ;;  %v2455_v39 = vsel %vm433_vm2, %v4933_v35, 0.0 }
 0x38f   :  { %v4935_v37 = vpop.eup %4270 }
 0x390   :  { %v2617_v30 = vsel %vm433_vm2, %v4935_v37, 0.0  ;;  %v4941_v40 = vpop.eup %4272 }
 0x391   :  { %2456 = vadd.xlane.f32.xlu0 %v2455_v39  ;;  %2618 = vadd.xlane.f32.xlu1 %v2617_v30  ;;  %v2783_v41 = vsel %vm433_vm2, %v4941_v40, 0.0 }
 0x393   :  { %v4954_v51 = vpop.eup %4274 }
 0x394   :  { %v2948_v27 = vsel %vm433_vm2, %v4954_v51, 0.0 }
 0x395   :  { %2784 = vadd.xlane.f32.xlu0 %v2783_v41 }
 0x3a2   :  { %2282 = vrot.lane.b32.xlu1 %v4707_v46, %s4481_s2 }
 0x3a6   :  { %2623 = vrot.lane.b32.xlu1 %v4702_v43, %s4480_s21 }
 0x3aa   :  { %2788 = vrot.lane.b32.xlu1 %v4702_v43, %s4479_s20 }
 0x3ab   :  { %2117 = vrot.lane.b32.xlu0 %v4707_v46, %s4479_s20 }
 0x3cd   :  { %v604_v55 = vpop.xlane.xlu0 %603 }
 0x3ce   :  { %4276 = vrcp.f32 %v604_v55  ;;  %2949 = vadd.xlane.f32.xlu1 %v2948_v27  ;;  %v3045_v55 = vld [vmem:[#allocation7 + $0x8] sm:$0xff]  ;;  %v3046_v27 = vld [vmem:[#allocation7 + $0x10] sm:$0xff] }
 0x3d1   :  { %v770_v58 = vpop.xlane.xlu1 %769 }
 0x3d2   :  { %4278 = vrcp.f32 %v770_v58 }
 0x3d8   :  { %v4277_v52 = vpop.eup %4276 }
 0x3d9   :  { %v606_v61 = vmul.f32 %v4277_v52, %v4869_v22  ;;  %v1115_v22 = vpop.xlane.xlu1 %1114  ;;  %v3047_v52 = vld [vmem:[#allocation7 + $0x18] sm:$0xff] }
 0x3db   :  { %3839 = vmatmul.mubr.msk.f32.vlgmr.msra.gmra.mrb[8].mxu1 %vm433_vm2, %v606_v61  ;;  %v4087_v61 = vpack.c.bf16 %v3047_v52, %v3046_v27 }
 0x3dc   :  { %v4279_v62 = vpop.eup %4278  ;;  %3847 = vmatpush3.msra.mxu1 %v4808_v26  ;;  %3848 = vmatprep.mubr.msk.f32.mxu1 %vm4478_vm0, %v4477_v0  ;;  %v1612_v26 = vpop.permute.xlu0 %1611 }
 0x3dd   :  { %v772_v63 = vmul.f32 %v4279_v62, %v4873_v28  ;;  %3856 = vmatprep.subr.mxu1 %v4477_v0  ;;  %v3048_v62 = vld [vmem:[#allocation7 + $0x20] sm:$0xff] }
 0x3df   :  { %2953 = vrot.lane.b32.xlu1 %v4702_v43, %s4481_s2  ;;  %3849 = vmatmul.mubr.msk.f32.vlgmr.msra.gmra.mrb[10].mxu1 %vm433_vm2, %v772_v63  ;;  %v3049_v63 = vld [vmem:[#allocation7 + $0x28] sm:$0xff] }
 0x3e0   :  { %3857 = vmatpush3.msra.mxu1 %v4818_v33  ;;  %3858 = vmatprep.mubr.msk.f32.mxu1 %vm4478_vm0, %v4477_v0 }
 0x3e1   :  { %3866 = vmatprep.subr.mxu1 %v4477_v0  ;;  %v1443_v2 = vpop.xlane.xlu1 %1442 }
 0x402   :  { %v935_v1 = vpop.xlane.xlu0 %934 }
 0x403   :  { %4280 = vrcp.f32 %v935_v1 }
 0x404   :  { %4282 = vrcp.f32 %v1115_v22  ;;  %v3051_v22 = vld [vmem:[#allocation7 + $0x38] sm:$0xff] }
 0x406   :  { %v1277_v28 = vpop.xlane.xlu0 %1276 }
 0x407   :  { %4284 = vrcp.f32 %v1277_v28  ;;  %v3052_v28 = vld [vmem:[#allocation7 + $0x40] sm:$0xff] }
 0x408   :  { %4286 = vrcp.f32 %v1443_v2  ;;  %v3053_v2 = vld [vmem:[#allocation7 + $0x48] sm:$0xff] }
 0x40d   :  { %v4281_v3 = vpop.eup %4280 }
 0x40e   :  { %v937_v4 = vmul.f32 %v4281_v3, %v4897_v20  ;;  %v4283_v5 = vpop.eup %4282  ;;  %v4099_v3 = vpack.c.bf16 %v3053_v2, %v3052_v28 }
 0x40f   :  { %v1117_v33 = vmul.f32 %v4283_v5, %v4878_v23  ;;  %v3055_v5 = vld [vmem:[#allocation7 + $0x58] sm:$0xff] }
 0x410   :  { %3859 = vmatmul.mubr.msk.f32.vlgmr.msra.gmra.mrb[12].mxu1 %vm433_vm2, %v937_v4  ;;  %v3054_v4 = vld [vmem:[#allocation7 + $0x50] sm:$0xff] }
 0x411   :  { %3867 = vmatpush3.msra.mxu1 %v4704_v45  ;;  %3868 = vmatprep.mubr.msk.f32.mxu1 %vm4478_vm0, %v4477_v0  ;;  %v4285_v6 = vpop.eup %4284 }
 0x412   :  { %v1608_v38 = vpop.xlane.xlu0 %1607  ;;  %3876 = vmatprep.subr.mxu1 %v4477_v0  ;;  %v1279_v20 = vmul.f32 %v4285_v6, %v4902_v60  ;;  %v4287_v8 = vpop.eup %4286 }
 0x413   :  { %4288 = vrcp.f32 %v1608_v38 }
 0x414   :  { %3869 = vmatmul.mubr.msk.f32.vlgmr.msra.gmra.mrb[14].mxu1 %vm433_vm2, %v1117_v33  ;;  %v4103_v33 = vpack.c.bf16 %v3055_v5, %v3054_v4 }
 0x415   :  { %3877 = vmatpush3.msra.mxu1 %v4864_v7  ;;  %3878 = vmatprep.mubr.msk.f32.mxu1 %vm4478_vm0, %v4477_v0  ;;  %v1445_v7 = vmul.f32 %v4287_v8, %v4882_v36 }
 0x416   :  { %v1786_v45 = vpop.xlane.xlu0 %1785  ;;  %3886 = vmatprep.subr.mxu1 %v4477_v0  ;;  %v1948_v9 = vpop.xlane.xlu1 %1947 }
 0x417   :  { %4290 = vrcp.f32 %v1786_v45  ;;  %v3057_v45 = vld [vmem:[#allocation7 + $0x68] sm:$0xff] }
 0x418   :  { %3879 = vmatmul.mubr.msk.f32.vlgmr.msra.gmra.mrb[16].mxu1 %vm433_vm2, %v1279_v20  ;;  %4292 = vrcp.f32 %v1948_v9  ;;  %v3056_v20 = vld [vmem:[#allocation7 + $0x60] sm:$0xff] }
 0x419   :  { %3887 = vmatpush3.msra.mxu1 %v4895_v56  ;;  %3888 = vmatprep.mubr.msk.f32.mxu1 %vm4478_vm0, %v4477_v0  ;;  %v4107_v8 = vpack.c.bf16 %v3057_v45, %v3056_v20 }
 0x41a   :  { %v2114_v23 = vpop.xlane.xlu0 %2113  ;;  %3896 = vmatprep.subr.mxu1 %v4477_v0  ;;  %v2279_v10 = vpop.xlane.xlu1 %2278 }
 0x41b   :  { %4294 = vrcp.f32 %v2114_v23  ;;  %v3058_v23 = vld [vmem:[#allocation7 + $0x70] sm:$0xff] }
 0x41c   :  { %3889 = vmatmul.mubr.msk.f32.vlgmr.msra.gmra.mrb[18].mxu1 %vm433_vm2, %v1445_v7  ;;  %4296 = vrcp.f32 %v2279_v10 }
 0x41d   :  { %v4289_v60 = vpop.eup %4288  ;;  %3897 = vmatpush3.msra.mxu1 %v1612_v26  ;;  %3898 = vmatprep.mubr.msk.f32.mxu1 %vm4478_vm0, %v4477_v0  ;;  %v3050_v26 = vld [vmem:[#allocation7 + $0x30] sm:$0xff] }
 0x41e   :  { %v1610_v34 = vmul.f32 %v4289_v60, %v4913_v21  ;;  %v2457_v56 = vpop.xlane.xlu0 %2456  ;;  %3906 = vmatprep.subr.mxu1 %v4477_v0  ;;  %v2619_v17 = vpop.xlane.xlu1 %2618  ;;  %v4095_v1 = vpack.c.bf16 %v3051_v22, %v3050_v26  ;;  %v3059_v60 = vld [vmem:[#allocation7 + $0x78] sm:$0xff] }
 0x41f   :  { %4298 = vrcp.f32 %v2457_v56 }
 0x420   :  { %3899 = vmatmul.mubr.msk.f32.vlgmr.msra.gmra.mrb[20].mxu1 %vm433_vm2, %v1610_v34  ;;  %4300 = vrcp.f32 %v2619_v17  ;;  %v4111_v34 = vpack.c.bf16 %v3059_v60, %v3058_v23  ;;  %v3629_v60 = vld [vmem:[%s5162_s4] ss:$0 sm:$0xff] }
 0x421   :  { %3907 = vmatpush3.msra.mxu1 %v4707_v46  ;;  %3908 = vmatprep.mubr.msk.f32.mxu1 %vm4478_vm0, %v4477_v0  ;;  %v4291_v36 = vpop.eup %4290 }
 0x422   :  { %v2785_v47 = vpop.xlane.xlu0 %2784  ;;  %3916 = vmatprep.subr.mxu1 %v4477_v0  ;;  %v1788_v12 = vmul.f32 %v4291_v36, %v4917_v11  ;;  %v4293_v13 = vpop.eup %4292 }
 0x423   :  { %v1950_v46 = vmul.f32 %v4293_v13, %v4919_v50  ;;  %v2283_v54 = vpop.permute.xlu1 %2282  ;;  %4302 = vrcp.f32 %v2785_v47 }
 0x424   :  { %3909 = vmatmul.mubr.msk.f32.vlgmr.msra.gmra.mrb[22].mxu1 %vm433_vm2, %v1788_v12 }
 0x425   :  { %3917 = vmatpush3.msra.mxu1 %v4956_v53  ;;  %3918 = vmatprep.mubr.msk.f32.mxu1 %vm4478_vm0, %v4477_v0  ;;  %v4295_v42 = vpop.eup %4294  ;;  %v3044_v53 = vld [vmem:[#allocation7] sm:$0xff] }
 0x426   :  { %v2118_v19 = vpop.permute.xlu0 %2117  ;;  %3926 = vmatprep.subr.mxu1 %v4477_v0  ;;  %v2116_v21 = vmul.f32 %v4295_v42, %v4925_v29  ;;  %v4297_v24 = vpop.eup %4296  ;;  %v4083_v58 = vpack.c.bf16 %v3045_v55, %v3044_v53 }
 0x427   :  { %v2281_v25 = vmul.f32 %v4297_v24, %v4927_v14  ;;  %v2624_v59 = vpop.permute.xlu1 %2623 }
 0x428   :  { %3919 = vmatmul.mubr.msk.f32.vlgmr.msra.gmra.mrb[24].mxu1 %vm433_vm2, %v1950_v46  ;;  %4084 = vmatprep.subr.bf16.mxu0 %v4083_v58 }
 0x429   :  { %3927 = vmatpush3.msra.mxu1 %v2118_v19  ;;  %3928 = vmatprep.mubr.msk.f32.mxu1 %vm4478_vm0, %v4477_v0  ;;  %v4299_v11 = vpop.eup %4298 }
 0x42a   :  { %3936 = vmatprep.subr.mxu1 %v4477_v0  ;;  %v2459_v50 = vmul.f32 %v4299_v11, %v4933_v35  ;;  %v4301_v57 = vpop.eup %4300  ;;  %4086 = vmatpush3.bf16.msra.mxu0 %v4083_v58 }
 0x42b   :  { %v2621_v29 = vmul.f32 %v4301_v57, %v4935_v37  ;;  %v2789_v14 = vpop.permute.xlu1 %2788  ;;  %4088 = vmatprep.subr.bf16.mxu0 %v4087_v61 }
 0x42c   :  { %3929 = vmatmul.mubr.msk.f32.vlgmr.msra.gmra.mrb[26].mxu1 %vm433_vm2, %v2116_v21 }
 0x42d   :  { %3937 = vmatpush3.msra.mxu1 %v2283_v54  ;;  %3938 = vmatprep.mubr.msk.f32.mxu1 %vm4478_vm0, %v4477_v0 }
 0x42e   :  { %3946 = vmatprep.subr.mxu1 %v4477_v0  ;;  %4090 = vmatpush3.bf16.msra.mxu0 %v4087_v61 }
 0x430   :  { %3939 = vmatmul.mubr.msk.f32.vlgmr.msra.gmra.mrb[28].mxu1 %vm433_vm2, %v2281_v25 }
 0x431   :  { %3947 = vmatpush3.msra.mxu1 %v4702_v43  ;;  %3948 = vmatprep.mubr.msk.f32.mxu1 %vm4478_vm0, %v4477_v0  ;;  %v4303_v43 = vpop.eup %4302 }
 0x432   :  { %3956 = vmatprep.subr.mxu1 %v4477_v0  ;;  %v2787_v32 = vmul.f32 %v4303_v43, %v4941_v40 }
 0x434   :  { %3949 = vmatmul.mubr.msk.f32.vlgmr.msra.gmra.mrb[30].mxu1 %vm433_vm2, %v2459_v50 }
 0x435   :  { %3957 = vmatpush3.msra.mxu1 %v2624_v59  ;;  %3958 = vmatprep.mubr.msk.f32.mxu1 %vm4478_vm0, %v4477_v0 }
 0x436   :  { %3966 = vmatprep.subr.mxu1 %v4477_v0 }
 0x438   :  { %3959 = vmatmul.mubr.msk.f32.vlgmr.msra.gmra.mrb[32].mxu1 %vm433_vm2, %v2621_v29 }
 0x439   :  { %3967 = vmatpush3.msra.mxu1 %v2789_v14  ;;  %3968 = vmatprep.mubr.msk.f32.mxu1 %vm4478_vm0, %v4477_v0 }
 0x43a   :  { %v5032_v31 = vpop.f32.mrb[6].mxu1  ;;  %3976 = vmatprep.subr.mxu1 %v4477_v0 }
 0x43b   :  { %v3830_v35 = vpop.f32.mrb[7].mxu1 }
 0x43c   :  { %3969 = vmatmul.mubr.msk.f32.vlgmr.msra.gmra.mrb[34].mxu1 %vm433_vm2, %v2787_v32 }
 0x43d   :  { %3978 = vmatprep.mubr.msk.f32.mxu1 %vm4478_vm0, %v4477_v0 }
 0x45b   :  { %v2950_v37 = vpop.xlane.xlu1 %2949 }
 0x45c   :  { %4304 = vrcp.f32 %v2950_v37 }
 0x45f   :  { %v2954_v39 = vpop.permute.xlu1 %2953 }
 0x460   :  { %3977 = vmatpush3.msra.mxu1 %v2954_v39 }
 0x466   :  { %v4305_v30 = vpop.eup %4304 }
 0x467   :  { %v2952_v41 = vmul.f32 %v4305_v30, %v4954_v51  ;;  %v4091_v51 = vpack.c.bf16 %v3049_v63, %v3048_v62 }
 0x469   :  { %3979 = vmatmul.mubr.msk.f32.vlgmr.msra.gmra.mrb[36].mxu1 %vm433_vm2, %v2952_v41  ;;  %4092 = vmatprep.subr.bf16.mxu0 %v4091_v51 }
 0x46a   :  { %3331 = vmatprep.mubr.f32.mxu1 %v4477_v0  ;;  %4094 = vmatpush3.bf16.msra.mxu0 %v4091_v51 }
 0x46b   :  { %4096 = vmatprep.subr.bf16.mxu0 %v4095_v1 }
 0x46e   :  { %4098 = vmatpush3.bf16.msra.mxu0 %v4095_v1 }
 0x46f   :  { %4100 = vmatprep.subr.bf16.mxu0 %v4099_v3 }
 0x472   :  { %4102 = vmatpush3.bf16.msra.mxu0 %v4099_v3 }
 0x473   :  { %4104 = vmatprep.subr.bf16.mxu0 %v4103_v33 }
 0x476   :  { %4106 = vmatpush3.bf16.msra.mxu0 %v4103_v33 }
 0x477   :  { %4108 = vmatprep.subr.bf16.mxu0 %v4107_v8 }
 0x47a   :  { %4110 = vmatpush3.bf16.msra.mxu0 %v4107_v8 }
 0x47b   :  { %4112 = vmatprep.subr.bf16.mxu0 %v4111_v34 }
 0x47e   :  { %4114 = vmatpush3.bf16.msra.mxu0 %v4111_v34 }
 0x4ae   :  { %v680_v40 = vpop.f32.mrb[8].mxu1 }
 0x4af   :  { %v3840_v44 = vpop.f32.mrb[9].mxu1 }
 0x4b2   :  { %v845_v48 = vpop.f32.mrb[10].mxu1 }
 0x4b3   :  { %v3850_v49 = vpop.f32.mrb[11].mxu1 }
 0x4e3   :  { %v1010_v38 = vpop.f32.mrb[12].mxu1 }
 0x4e4   :  { %v3860_v6 = vpop.f32.mrb[13].mxu1 }
 0x4e7   :  { %v1187_v9 = vpop.f32.mrb[14].mxu1 }
 0x4e8   :  { %v3870_v7 = vpop.f32.mrb[15].mxu1 }
 0x4eb   :  { %v1353_v56 = vpop.f32.mrb[16].mxu1 }
 0x4ec   :  { %v4212_v10 = vpack.i.bf16 %v1353_v56, %v680_v40  ;;  %v3880_v36 = vpop.f32.mrb[17].mxu1 }
 0x4ee   :  { %4213 = vrot.lane.b32.xlu0 %v4212_v10, %s4481_s2 }
 0x4ef   :  { %v1518_v47 = vpop.f32.mrb[18].mxu1 }
 0x4f0   :  { %v4217_v12 = vpack.i.bf16 %v1518_v47, %v845_v48  ;;  %v3890_v13 = vpop.f32.mrb[19].mxu1  ;;  %v4322_v47 = vld [vmem:[#allocation2 + $0x8] sm:$0xff] }
 0x4f1   :  { %v4323_v13 = vld [vmem:[#allocation2] sm:$0xff] }
 0x4f2   :  { %4218 = vrot.lane.b32.xlu1 %v4217_v12, %s4479_s20 }
 0x4f3   :  { %v1683_v46 = vpop.f32.mrb[20].mxu1 }
 0x4f4   :  { %v4222_v17 = vpack.i.bf16 %v1683_v46, %v1010_v38  ;;  %v3900_v19 = vpop.f32.mrb[21].mxu1 }
 0x4f6   :  { %4223 = vrot.lane.b32.xlu0 %v4222_v17, %s4480_s21 }
 0x4f7   :  { %v1858_v42 = vpop.f32.mrb[22].mxu1 }
 0x4f8   :  { %v3910_v21 = vpop.f32.mrb[23].mxu1 }
 0x4fb   :  { %v2024_v24 = vpop.f32.mrb[24].mxu1 }
 0x4fc   :  { %v3920_v54 = vpop.f32.mrb[25].mxu1 }
 0x4ff   :  { %v2189_v25 = vpop.f32.mrb[26].mxu1 }
 0x500   :  { %v3930_v11 = vpop.f32.mrb[27].mxu1 }
 0x503   :  { %v2354_v50 = vpop.f32.mrb[28].mxu1 }
 0x504   :  { %v3940_v59 = vpop.f32.mrb[29].mxu1 }
 0x505   :  { %v3226_v59 = vld [vmem:[#allocation8 + $0x18] sm:$0xff] }
 0x507   :  { %v2529_v57 = vpop.f32.mrb[30].mxu1 }
 0x508   :  { %v3950_v29 = vpop.f32.mrb[31].mxu1 }
 0x50b   :  { %v2695_v43 = vpop.f32.mrb[32].mxu1 }
 0x50c   :  { %v4227_v14 = vpack.i.bf16 %v2695_v43, %v2024_v24  ;;  %v3960_v32 = vpop.f32.mrb[33].mxu1  ;;  %v4324_v24 = vld [vmem:[#allocation2 + $0x10] sm:$0xff] }
 0x50d   :  { %v3225_v43 = vld [vmem:[#allocation8 + $0x10] sm:$0xff]  ;;  %v3230_v32 = vld [vmem:[#allocation8 + $0x38] sm:$0xff] }
 0x50e   :  { %4228 = vrot.lane.b32.xlu1 %v4227_v14, %s4481_s2  ;;  %v3228_v14 = vld [vmem:[#allocation8 + $0x28] sm:$0xff] }
 0x50f   :  { %v2860_v35 = vpop.f32.mrb[34].mxu1 }
 0x510   :  { %v4232_v37 = vpack.i.bf16 %v2860_v35, %v2189_v25  ;;  %v3970_v39 = vpop.f32.mrb[35].mxu1  ;;  %v4325_v25 = vld [vmem:[#allocation2 + $0x18] sm:$0xff] }
 0x511   :  { %v3227_v39 = vld [vmem:[#allocation8 + $0x20] sm:$0xff] }
 0x512   :  { %4233 = vrot.lane.b32.xlu0 %v4232_v37, %s4479_s20  ;;  %v4119_v37 = vpack.c.bf16 %v3230_v32, %v3228_v14  ;;  %v3380_v32 = vld [vmem:[#allocation10 + $0x80] sm:$0xff] }
 0x53c   :  { %v3025_v30 = vpop.f32.mrb[36].mxu1 }
 0x53d   :  { %v4237_v41 = vpack.i.bf16 %v3025_v30, %v2354_v50  ;;  %v3980_v40 = vpop.f32.mrb[37].mxu1  ;;  %v3224_v50 = vld [vmem:[#allocation8 + $0x8] sm:$0xff]  ;;  %v3229_v30 = vld [vmem:[#allocation8 + $0x30] sm:$0xff] }
 0x53e   :  { %v4115_v29 = vpack.c.bf16 %v3226_v59, %v3224_v50  ;;  %v3234_v40 = vld [vmem:[#allocation8 + $0x58] sm:$0xff] }
 0x53f   :  { %4238 = vrot.lane.b32.xlu1 %v4237_v41, %s4480_s21  ;;  %v3232_v41 = vld [vmem:[#allocation8 + $0x48] sm:$0xff] }
 0x540   :  { %4116 = vmatprep.subr.bf16.mxu1 %v4115_v29 }
 0x560   :  { %v4214_v44 = vpop.permute.xlu0 %4213 }
 0x561   :  { %v4216_v49 = vunpack.i.h.bf16 %v4214_v44  ;;  %v4215_v53 = vunpack.i.l.bf16 %v4214_v44  ;;  %v4121_v44 = vpack.c.bf16 %v3229_v30, %v3227_v39  ;;  %v3365_v30 = vld [vmem:[#allocation10 + $0x8] sm:$0xff] }
 0x563   :  { %v1699_v52 = vsel %vm356_vm1, %v1187_v9, %v4216_v49  ;;  %v1026_v63 = vsel %vm356_vm1, %v5032_v31, %v4215_v53  ;;  %v3231_v49 = vld [vmem:[#allocation8 + $0x40] sm:$0xff]  ;;  %v3233_v53 = vld [vmem:[#allocation8 + $0x50] sm:$0xff] }
 0x564   :  { %v4219_v48 = vpop.permute.xlu1 %4218 }
 0x565   :  { %v4221_v55 = vunpack.i.h.bf16 %v4219_v48  ;;  %v4220_v27 = vunpack.i.l.bf16 %v4219_v48  ;;  %v4123_v48 = vpack.c.bf16 %v3234_v40, %v3232_v41  ;;  %v3383_v41 = vld [vmem:[#allocation10 + $0x98] sm:$0xff] }
 0x567   :  { %v1028_v51 = vsel %vm1027_vm3, %v1026_v63, %v4220_v27  ;;  %v1700_v26 = vsel %vm1027_vm3, %v1699_v52, %v4221_v55  ;;  %v4125_v55 = vpack.c.bf16 %v3233_v53, %v3231_v49  ;;  %v3367_v49 = vld [vmem:[#allocation10 + $0x18] sm:$0xff]  ;;  %v3385_v53 = vld [vmem:[#allocation10 + $0xa8] sm:$0xff] }
 0x568   :  { %v4224_v58 = vpop.permute.xlu0 %4223 }
 0x569   :  { %v4226_v61 = vunpack.i.h.bf16 %v4224_v58  ;;  %v4225_v62 = vunpack.i.l.bf16 %v4224_v58 }
 0x56b   :  { %v1030_v22 = vsel %vm1029_vm4, %v1028_v51, %v4225_v62  ;;  %v1701_v1 = vsel %vm1029_vm4, %v1700_v26, %v4226_v61 }
 0x56c   :  { %4013 = vmatprep.mubr.f32.mxu0 %v1030_v22  ;;  %v3236_v22 = vld [vmem:[#allocation8 + $0x68] sm:$0xff] }
 0x56d   :  { %4014 = vmatmul.mubr.f32.vlgmr.msra.gmra.mrb[38].mxu0 %v1701_v1  ;;  %v3238_v1 = vld [vmem:[#allocation8 + $0x78] sm:$0xff] }
 0x580   :  { %v4229_v28 = vpop.permute.xlu1 %4228 }
 0x581   :  { %v4231_v2 = vunpack.i.h.bf16 %v4229_v28  ;;  %v4230_v3 = vunpack.i.l.bf16 %v4229_v28  ;;  %v4127_v28 = vpack.c.bf16 %v3238_v1, %v3236_v22  ;;  %v3370_v1 = vld [vmem:[#allocation10 + $0x30] sm:$0xff] }
 0x583   :  { %v2370_v38 = vsel %vm356_vm1, %v1858_v42, %v4230_v3  ;;  %v3041_v31 = vsel %vm356_vm1, %v2529_v57, %v4231_v2  ;;  %v3223_v57 = vld [vmem:[#allocation8] sm:$0xff]  ;;  %v3237_v3 = vld [vmem:[#allocation8 + $0x70] sm:$0xff] }
 0x584   :  { %v4234_v4 = vpop.permute.xlu0 %4233  ;;  %v4117_v35 = vpack.c.bf16 %v3225_v43, %v3223_v57  ;;  %v3235_v2 = vld [vmem:[#allocation8 + $0x60] sm:$0xff] }
 0x585   :  { %v4236_v5 = vunpack.i.h.bf16 %v4234_v4  ;;  %v4235_v33 = vunpack.i.l.bf16 %v4234_v4  ;;  %v4129_v4 = vpack.c.bf16 %v3237_v3, %v3235_v2  ;;  %v3388_v2 = vld [vmem:[#allocation10 + $0xc0] sm:$0xff]  ;;  %v3389_v3 = vld [vmem:[#allocation10 + $0xc8] sm:$0xff] }
 0x586   :  { %4118 = vmatpush1.bf16.msra.mxu1 %v4117_v35  ;;  %v3381_v35 = vld [vmem:[#allocation10 + $0x88] sm:$0xff] }
 0x587   :  { %v2371_v6 = vsel %vm1027_vm3, %v2370_v38, %v4235_v33  ;;  %v3042_v20 = vsel %vm1027_vm3, %v3041_v31, %v4236_v5  ;;  %4120 = vmatprep.subr.bf16.mxu1 %v4119_v37  ;;  %v3240_v5 = vld [vmem:[#allocation8 + $0x88] sm:$0xff]  ;;  %v3242_v33 = vld [vmem:[#allocation8 + $0x98] sm:$0xff]  ;;  %v3239_v38 = vld [vmem:[#allocation8 + $0x80] sm:$0xff]  ;;  %v4147_v39 = vpack.c.bf16 %v3381_v35, %v3380_v32 }
 0x588   :  { %v4131_v31 = vpack.c.bf16 %v3242_v33, %v3240_v5  ;;  %v3364_v37 = vld [vmem:[#allocation10] sm:$0xff]  ;;  %v4163_v5 = vpack.c.bf16 %v3389_v3, %v3388_v2 }
 0x589   :  { %v5090_v40 = vpack.c.bf16 %v3365_v30, %v3364_v37  ;;  %4148 = vmatprep.subr.bf16.mxu0 %v4147_v39  ;;  %v3372_v33 = vld [vmem:[#allocation10 + $0x40] sm:$0xff] }
 0x58a   :  { %4122 = vmatpush1.bf16.msra.mxu1 %v4121_v44 }
 0x58b   :  { %4124 = vmatprep.subr.bf16.mxu1 %v4123_v48  ;;  %v3366_v48 = vld [vmem:[#allocation10 + $0x10] sm:$0xff]  ;;  %4150 = vmatpush3.bf16.msra.mxu0 %v5090_v40 }
 0x58e   :  { %4126 = vmatpush1.bf16.msra.mxu1 %v4125_v55  ;;  %v4153_v55 = vpack.c.bf16 %v3367_v49, %v3366_v48 }
 0x58f   :  { %4128 = vmatprep.subr.bf16.mxu1 %v4127_v28  ;;  %v3371_v28 = vld [vmem:[#allocation10 + $0x38] sm:$0xff] }
 0x592   :  { %4130 = vmatpush1.bf16.msra.mxu1 %v4129_v4  ;;  %v4161_v4 = vpack.c.bf16 %v3371_v28, %v3370_v1 }
 0x593   :  { %4132 = vmatprep.subr.bf16.mxu1 %v4131_v31  ;;  %v3390_v31 = vld [vmem:[#allocation10 + $0xd0] sm:$0xff] }
 0x5b1   :  { %v4239_v45 = vpop.permute.xlu1 %4238 }
 0x5b2   :  { %v4241_v8 = vunpack.i.h.bf16 %v4239_v45  ;;  %v4240_v9 = vunpack.i.l.bf16 %v4239_v45  ;;  %v3246_v45 = vld [vmem:[#allocation8 + $0xb8] sm:$0xff] }
 0x5b4   :  { %v2372_v7 = vsel %vm1029_vm4, %v2371_v6, %v4240_v9  ;;  %v3043_v23 = vsel %vm1029_vm4, %v3042_v20, %v4241_v8  ;;  %v3241_v6 = vld [vmem:[#allocation8 + $0x90] sm:$0xff]  ;;  %v3244_v20 = vld [vmem:[#allocation8 + $0xa8] sm:$0xff] }
 0x5b5   :  { %4016 = vmatprep.mubr.f32.mxu0 %v2372_v7  ;;  %v4133_v8 = vpack.c.bf16 %v3241_v6, %v3239_v38  ;;  %v4135_v9 = vpack.c.bf16 %v3246_v45, %v3244_v20  ;;  %v3243_v7 = vld [vmem:[#allocation8 + $0xa0] sm:$0xff]  ;;  %v3373_v38 = vld [vmem:[#allocation10 + $0x48] sm:$0xff]  ;;  %v3391_v6 = vld [vmem:[#allocation10 + $0xd8] sm:$0xff] }
 0x5b6   :  { %4017 = vmatmul.mubr.f32.gmra.mrb[40].mxu0 %v3043_v23  ;;  %v3245_v23 = vld [vmem:[#allocation8 + $0xb0] sm:$0xff]  ;;  %v4165_v20 = vpack.c.bf16 %v3373_v38, %v3372_v33  ;;  %v4167_v45 = vpack.c.bf16 %v3391_v6, %v3390_v31 }
 0x5b7   :  { %4134 = vmatpush1.bf16.msra.mxu1 %v4133_v8  ;;  %v3374_v8 = vld [vmem:[#allocation10 + $0x50] sm:$0xff] }
 0x5b8   :  { %4136 = vmatprep.subr.bf16.mxu1 %v4135_v9  ;;  %v3375_v9 = vld [vmem:[#allocation10 + $0x58] sm:$0xff] }
 0x640   :  { %v4015_v34 = vpop.f32.mrb[38].mxu0 }
 0x641   :  { %v3139_v56 = vadd.f32 %v4015_v34, %v3629_v60  ;;  %v3133_v10 = vpop.f32.mrb[39].mxu0  ;;  %v3250_v34 = vld [vmem:[#allocation8 + $0xd8] sm:$0xff] }
 0x642   :  { %v3134_v36 = vadd.f32 %v3629_v60, %v3133_v10 }
 0x643   :  { %v3153_v12 = vadd.f32 %v4322_v47, %v3139_v56  ;;  %v4137_v56 = vpack.c.bf16 %v3245_v23, %v3243_v7  ;;  %v3249_v47 = vld [vmem:[#allocation8 + $0xd0] sm:$0xff]  ;;  %v3392_v7 = vld [vmem:[#allocation10 + $0xe0] sm:$0xff]  ;;  %v3393_v23 = vld [vmem:[#allocation10 + $0xe8] sm:$0xff] }
 0x644   :  { %v3152_v46 = vadd.f32 %v4323_v13, %v3134_v36  ;;  %v3247_v36 = vld [vmem:[#allocation8 + $0xc0] sm:$0xff]  ;;  %v3254_v13 = vld [vmem:[#allocation8 + $0xf8] sm:$0xff] }
 0x645   :  { %3160 = vadd.xlane.f32.xlu1 %v3153_v12  ;;  %4138 = vmatpush1.bf16.msra.mxu1 %v4137_v56 }
 0x646   :  { %3158 = vadd.xlane.f32.xlu0 %v3152_v46 }
 0x689   :  { %v4018_v17 = vpop.f32.mrb[40].mxu0 }
 0x68a   :  { %v3143_v19 = vpop.f32.mrb[41].mxu0  ;;  %v3149_v21 = vadd.f32 %v4018_v17, %v3629_v60 }
 0x68b   :  { %v3144_v42 = vadd.f32 %v3629_v60, %v3143_v19  ;;  %v3248_v60 = vld [vmem:[#allocation8 + $0xc8] sm:$0xff]  ;;  %v3251_v19 = vld [vmem:[#allocation8 + $0xe0] sm:$0xff] }
 0x68c   :  { %v5069_v11 = vadd.f32 %v4325_v25, %v3149_v21  ;;  %v4139_v10 = vpack.c.bf16 %v3250_v34, %v3248_v60  ;;  %v4169_v60 = vpack.c.bf16 %v3375_v9, %v3374_v8  ;;  %v4171_v34 = vpack.c.bf16 %v3393_v23, %v3392_v7 }
 0x68d   :  { %v5066_v54 = vadd.f32 %v4324_v24, %v3144_v42  ;;  %v3253_v42 = vld [vmem:[#allocation8 + $0xf0] sm:$0xff] }
 0x68e   :  { %4140 = vmatprep.subr.bf16.mxu1 %v4139_v10  ;;  %v4145_v21 = vpack.c.bf16 %v3253_v42, %v3251_v19  ;;  %v3630_v19 = vld [vmem:[%s5167_s9] ss:$0 sm:$0xff] }
 0x68f   :  { %3162 = vadd.xlane.f32.xlu0 %v5066_v54 }
 0x693   :  { %3164 = vadd.xlane.f32.xlu0 %v5069_v11 }
 0x6d2   :  { %v3161_v27 = vpop.xlane.xlu1 %3160 }
 0x6d3   :  { %v3168_v58 = vmul.f32 0.0078125, %v3161_v27  ;;  %v3159_v52 = vpop.xlane.xlu0 %3158 }
 0x6d4   :  { %v3167_v61 = vmul.f32 0.0078125, %v3159_v52  ;;  %v3369_v52 = vld [vmem:[#allocation10 + $0x28] sm:$0xff] }
 0x6d5   :  { %v5072_v62 = vsub.f32 %v3153_v12, %v3168_v58  ;;  %v3252_v12 = vld [vmem:[#allocation8 + $0xe8] sm:$0xff]  ;;  %v3368_v58 = vld [vmem:[#allocation10 + $0x20] sm:$0xff] }
 0x6d6   :  { %v5074_v63 = vsub.f32 %v3152_v46, %v3167_v61  ;;  %v4141_v46 = vpack.c.bf16 %v3249_v47, %v3247_v36  ;;  %v4143_v17 = vpack.c.bf16 %v3254_v13, %v3252_v12  ;;  %v3386_v61 = vld [vmem:[#allocation10 + $0xb0] sm:$0xff] }
 0x6d7   :  { %v3176_v51 = vmul.f32 %v5072_v62, %v5072_v62 }
 0x6d8   :  { %v3175_v26 = vmul.f32 %v5074_v63, %v5074_v63  ;;  %4142 = vmatpush1.bf16.msra.mxu1 %v4141_v46 }
 0x6d9   :  { %3181 = vadd.xlane.f32.xlu0 %v3176_v51  ;;  %4144 = vmatprep.subr.bf16.mxu1 %v4143_v17  ;;  %v3387_v51 = vld [vmem:[#allocation10 + $0xb8] sm:$0xff] }
 0x6da   :  { %3179 = vadd.xlane.f32.xlu1 %v3175_v26  ;;  %v4157_v26 = vpack.c.bf16 %v3369_v52, %v3368_v58  ;;  %v4159_v22 = vpack.c.bf16 %v3387_v51, %v3386_v61  ;;  %v3378_v52 = vld [vmem:[#allocation10 + $0x70] sm:$0xff]  ;;  %v3379_v61 = vld [vmem:[#allocation10 + $0x78] sm:$0xff] }
 0x6dc   :  { %4146 = vmatpush1.bf16.msra.mxu1 %v4145_v21 }
 0x6dd   :  { %4179 = vmatprep.subr.bf16.mxu1 %v4147_v39 }
 0x71c   :  { %v3163_v24 = vpop.xlane.xlu0 %3162 }
 0x71d   :  { %v3169_v25 = vmul.f32 0.0078125, %v3163_v24  ;;  %v3631_v24 = vld [vmem:[%s5168_s10] ss:$0 sm:$0xff] }
 0x71f   :  { %v5081_v50 = vsub.f32 %v5066_v54, %v3169_v25  ;;  %v3382_v54 = vld [vmem:[#allocation10 + $0x90] sm:$0xff] }
 0x720   :  { %v3165_v59 = vpop.xlane.xlu0 %3164  ;;  %v5092_v44 = vpack.c.bf16 %v3383_v41, %v3382_v54 }
 0x721   :  { %v3170_v57 = vmul.f32 0.0078125, %v3165_v59  ;;  %v3177_v29 = vmul.f32 %v5081_v50, %v5081_v50 }
 0x722   :  { %4152 = vmatprep.subr.bf16.mxu0 %v5092_v44 }
 0x723   :  { %v5086_v43 = vsub.f32 %v5069_v11, %v3170_v57  ;;  %3183 = vadd.xlane.f32.xlu1 %v3177_v29  ;;  %v3384_v11 = vld [vmem:[#allocation10 + $0xa0] sm:$0xff]  ;;  %4154 = vmatpush3.bf16.msra.mxu0 %v4153_v55 }
 0x724   :  { %v4155_v27 = vpack.c.bf16 %v3385_v53, %v3384_v11  ;;  %v3376_v11 = vld [vmem:[#allocation10 + $0x60] sm:$0xff]  ;;  %v3377_v53 = vld [vmem:[#allocation10 + $0x68] sm:$0xff] }
 0x725   :  { %v3178_v14 = vmul.f32 %v5086_v43, %v5086_v43 }
 0x726   :  { %4156 = vmatprep.subr.bf16.mxu0 %v4155_v27 }
 0x727   :  { %3185 = vadd.xlane.f32.xlu0 %v3178_v14  ;;  %4158 = vmatpush3.bf16.msra.mxu0 %v4157_v26 }
 0x728   :  { %4160 = vmatprep.subr.bf16.mxu0 %v4159_v22 }
 0x72b   :  { %4162 = vmatpush3.bf16.msra.mxu0 %v4161_v4 }
 0x72c   :  { %4164 = vmatprep.subr.bf16.mxu0 %v4163_v5 }
 0x72f   :  { %4166 = vmatpush3.bf16.msra.mxu0 %v4165_v20 }
 0x730   :  { %4168 = vmatprep.subr.bf16.mxu0 %v4167_v45 }
 0x733   :  { %4170 = vmatpush3.bf16.msra.mxu0 %v4169_v60 }
 0x734   :  { %4172 = vmatprep.subr.bf16.mxu0 %v4171_v34 }
 0x766   :  { %v3182_v56 = vpop.xlane.xlu0 %3181 }
 0x767   :  { %v3188_v10 = vmul.f32 0.0078125, %v3182_v56  ;;  %v3180_v36 = vpop.xlane.xlu1 %3179 }
 0x768   :  { %v3187_v47 = vmul.f32 0.0078125, %v3180_v36 }
 0x769   :  { %v3192_v12 = vadd.f32 1e-05, %v3188_v10 }
 0x76a   :  { %v3191_v13 = vadd.f32 1e-05, %v3187_v47  ;;  %v3632_v47 = vld [vmem:[%s5166_s8] ss:$0 sm:$0xff] }
 0x76b   :  { %4306 = vrsqrt.f32 %v3192_v12 }
 0x76c   :  { %4308 = vrsqrt.f32 %v3191_v13 }
 0x775   :  { %v4307_v46 = vpop.eup %4306 }
 0x776   :  { %v4309_v17 = vpop.eup %4308  ;;  %v3200_v21 = vmul.f32 %v4307_v46, %v5072_v62 }
 0x777   :  { %v3199_v42 = vmul.f32 %v4309_v17, %v5074_v63 }
 0x778   :  { %v3210_v57 = vmul.f32 %v3630_v19, %v3200_v21 }
 0x779   :  { %v3209_v25 = vmul.f32 %v3630_v19, %v3199_v42 }
 0x77a   :  { %v5109_v29 = vadd.f32 %v3631_v24, %v3210_v57 }
 0x77b   :  { %v5104_v59 = vadd.f32 %v3631_v24, %v3209_v25 }
 0x77d   :  { %3332 = vmatmul.mubr.f32.vlgmr.msra.gmra.mrb[38].mxu1 %v5104_v59 }
 0x77e   :  { %3337 = vmatprep.mubr.f32.mxu1 %v4477_v0  ;;  %4187 = vmatpush3.bf16.msra.mxu1 %v5090_v40 }
 0x77f   :  { %4180 = vmatprep.subr.bf16.mxu1 %v5092_v44 }
 0x781   :  { %3338 = vmatmul.mubr.f32.gmra.mrb[40].mxu1 %v5109_v29 }
 0x782   :  { %3343 = vmatprep.mubr.f32.mxu1 %v4477_v0  ;;  %4188 = vmatpush3.bf16.msra.mxu1 %v4153_v55  ;;  %v4173_v55 = vpack.c.bf16 %v3377_v53, %v3376_v11 }
 0x783   :  { %4181 = vmatprep.subr.bf16.mxu1 %v4155_v27  ;;  %v3395_v27 = vld [vmem:[#allocation10 + $0xf8] sm:$0xff] }
 0x784   :  { %4174 = vmatpush3.bf16.msra.mxu0 %v4173_v55 }
 0x786   :  { %4189 = vmatpush3.bf16.msra.mxu1 %v4157_v26 }
 0x787   :  { %4182 = vmatprep.subr.bf16.mxu1 %v4159_v22 }
 0x78a   :  { %4190 = vmatpush3.bf16.msra.mxu1 %v4161_v4 }
 0x78b   :  { %4183 = vmatprep.subr.bf16.mxu1 %v4163_v5 }
 0x78e   :  { %4191 = vmatpush3.bf16.msra.mxu1 %v4165_v20 }
 0x78f   :  { %4184 = vmatprep.subr.bf16.mxu1 %v4167_v45 }
 0x792   :  { %4192 = vmatpush3.bf16.msra.mxu1 %v4169_v60 }
 0x793   :  { %4185 = vmatprep.subr.bf16.mxu1 %v4171_v34 }
 0x796   :  { %4193 = vmatpush3.bf16.msra.mxu1 %v4173_v55 }
 0x7b0   :  { %v3184_v62 = vpop.xlane.xlu1 %3183 }
 0x7b1   :  { %v3189_v63 = vmul.f32 0.0078125, %v3184_v62 }
 0x7b3   :  { %v3193_v14 = vadd.f32 1e-05, %v3189_v63 }
 0x7b4   :  { %v3186_v32 = vpop.xlane.xlu0 %3185 }
 0x7b5   :  { %4310 = vrsqrt.f32 %v3193_v14  ;;  %v3190_v35 = vmul.f32 0.0078125, %v3186_v32 }
 0x7b7   :  { %v3194_v37 = vadd.f32 1e-05, %v3190_v35 }
 0x7b9   :  { %4312 = vrsqrt.f32 %v3194_v37 }
 0x7bf   :  { %v4311_v39 = vpop.eup %4310 }
 0x7c0   :  { %v3201_v30 = vmul.f32 %v4311_v39, %v5081_v50  ;;  %v3394_v50 = vld [vmem:[#allocation10 + $0xf0] sm:$0xff] }
 0x7c1   :  { %v4175_v58 = vpack.c.bf16 %v3395_v27, %v3394_v50 }
 0x7c2   :  { %v3211_v54 = vmul.f32 %v3630_v19, %v3201_v30 }
 0x7c3   :  { %v4313_v41 = vpop.eup %4312  ;;  %4176 = vmatprep.subr.bf16.mxu0 %v4175_v58  ;;  %4186 = vmatprep.subr.bf16.mxu1 %v4175_v58 }
 0x7c4   :  { %v5115_v40 = vadd.f32 %v3631_v24, %v3211_v54  ;;  %v3202_v44 = vmul.f32 %v4313_v41, %v5086_v43  ;;  %v4177_v43 = vpack.c.bf16 %v3379_v61, %v3378_v52 }
 0x7c6   :  { %3344 = vmatmul.mubr.f32.gmra.mrb[42].mxu1 %v5115_v40  ;;  %v3212_v48 = vmul.f32 %v3630_v19, %v3202_v44  ;;  %4178 = vmatpush3.bf16.msra.mxu0 %v4177_v43 }
 0x7c7   :  { %3349 = vmatprep.mubr.f32.mxu1 %v4477_v0  ;;  %4194 = vmatpush3.bf16.msra.mxu1 %v4177_v43  ;;  %v3255_v0 = vld [vmem:[%s5164_s6] sm:$0x3] }
 0x7c8   :  { %v5120_v49 = vadd.f32 %v3631_v24, %v3212_v48  ;;  %v3260_v51 = vrot.slane %v3255_v0, %v169_v18  ;;  %v3264_v26 = vrot.slane %v3255_v0, %v173_v16 }
 0x7ca   :  { %3350 = vmatmul.mubr.f32.gmra.mrb[44].mxu1 %v5120_v49 }
 0x850   :  { %v3333_v22 = vpop.f32.mrb[38].mxu1 }
 0x851   :  { %v3334_v1 = vadd.f32 %v3333_v22, %v3260_v51  ;;  %v3335_v28 = vpop.f32.mrb[39].mxu1 }
 0x852   :  { %v3336_v2 = vadd.f32 %v3335_v28, %v3264_v26 }
 0x853   :  { %v3356_v5 = vmax.f32 %v3334_v1, 0.0 }
 0x854   :  { %v3357_v3 = vmax.f32 %v3336_v2, 0.0  ;;  %v3339_v4 = vpop.f32.mrb[40].mxu1 }
 0x855   :  { %v3340_v33 = vadd.f32 %v3339_v4, %v3260_v51  ;;  %v3341_v38 = vpop.f32.mrb[41].mxu1 }
 0x856   :  { %v3342_v31 = vadd.f32 %v3341_v38, %v3264_v26  ;;  %3467 = vmatprep.mubr.f32.mxu0 %v3357_v3  ;;  %v3633_v3 = vld [vmem:[%s5169_s11] ss:$0 sm:$0xff]  ;;  %s4482_s11 = smov [#allocation11]  }
 0x857   :  { %3468 = vmatmul.mubr.f32.vlgmr.msra.gmra.mrb[42].mxu0 %v3356_v5  ;;  %v3358_v20 = vmax.f32 %v3340_v33, 0.0  ;;  %v3634_v5 = vld [vmem:[%s5170_s12] ss:$0 sm:$0xff]  ;;  %s3567_s12 = sshll.u32 %s4482_s11, 4  ;;  %s3568_s12 = int_to_ptr.vmem [resolvable:$true] %s3567_s12 }
 0x858   :  { %v3359_v6 = vmax.f32 %v3342_v31, 0.0  ;;  %s4436_s14 = scalar_lea.vmem %s3568_s12, 512  ;;  %p4441_p13 = scmp.lt.s32.totalorder %s3568_s12, %s3568_s12 }
 0x859   :  { %p4437_p12 = scmp.ne.s32.totalorder %s3568_s12, %s4436_s14  ;;  %p4442_p0 = scmp.lt.s32.totalorder %s4436_s14, %s4436_s14 }
 0x85a   :  { %3472 = vmatprep.mubr.f32.mxu0 %v3359_v6 }
 0x85b   :  { %3473 = vmatmul.mubr.f32.gmra.mrb[44].mxu0 %v3358_v20  ;;  %p4443_p1 = por %p4442_p0, %p4441_p13 }
 0x85d   :  { %p4444_p2 = pnand %p4443_p1, %p4437_p12 }
 0x899   :  { %v3345_v18 = vpop.f32.mrb[42].mxu1 }
 0x89a   :  { %v3346_v45 = vadd.f32 %v3345_v18, %v3260_v51  ;;  %v3347_v15 = vpop.f32.mrb[43].mxu1 }
 0x89b   :  { %v3348_v16 = vadd.f32 %v3347_v15, %v3264_v26 }
 0x89c   :  { %v3360_v7 = vmax.f32 %v3346_v45, 0.0 }
 0x89d   :  { %v3361_v8 = vmax.f32 %v3348_v16, 0.0  ;;  %v3351_v9 = vpop.f32.mrb[44].mxu1 }
 0x89e   :  { %v3352_v23 = vadd.f32 %v3351_v9, %v3260_v51  ;;  %v3353_v60 = vpop.f32.mrb[45].mxu1 }
 0x89f   :  { %v3354_v34 = vadd.f32 %v3353_v60, %v3264_v26  ;;  %3477 = vmatprep.mubr.f32.mxu1 %v3361_v8 }
 0x8a0   :  { %3478 = vmatmul.mubr.f32.vlgmr.msra.gmra.mrb[46].mxu1 %v3360_v7  ;;  %v3362_v10 = vmax.f32 %v3352_v23, 0.0 }
 0x8a1   :  { %v3363_v56 = vmax.f32 %v3354_v34, 0.0 }
 0x8a3   :  { %3482 = vmatprep.mubr.f32.mxu1 %v3363_v56 }
 0x8a4   :  { %3483 = vmatmul.mubr.f32.gmra.mrb[48].mxu1 %v3362_v10 }
 0x92a   :  { %v3771_v36 = vpop.f32.mrb[42].mxu0 }
 0x92b   :  { %v3772_v12 = vpop.f32.mrb[43].mxu0 }
 0x92c   :  { %v3773_v13 = vadd.f32 %v3772_v12, %v3771_v36 }
 0x92e   :  { %v3470_v46 = vadd.f32 %v3773_v13, %v3632_v47  ;;  %v3774_v17 = vpop.f32.mrb[44].mxu0 }
 0x92f   :  { %v3775_v19 = vpop.f32.mrb[45].mxu0 }
 0x930   :  { %v3776_v42 = vadd.f32 %v3775_v19, %v3774_v17  ;;  %v3488_v21 = vadd.f32 %v3470_v46, %v5104_v59 }
 0x932   :  { %v3475_v24 = vadd.f32 %v3776_v42, %v3632_v47  ;;  %3494 = vadd.xlane.f32.xlu1 %v3488_v21 }
 0x934   :  { %v3489_v25 = vadd.f32 %v3475_v24, %v5109_v29 }
 0x936   :  { %3496 = vadd.xlane.f32.xlu0 %v3489_v25 }
 0x973   :  { %v3777_v57 = vpop.f32.mrb[46].mxu1 }
 0x974   :  { %v3778_v62 = vpop.f32.mrb[47].mxu1 }
 0x975   :  { %v3779_v63 = vadd.f32 %v3778_v62, %v3777_v57 }
 0x977   :  { %v3480_v14 = vadd.f32 %v3779_v63, %v3632_v47  ;;  %v3780_v32 = vpop.f32.mrb[48].mxu1 }
 0x978   :  { %v3781_v35 = vpop.f32.mrb[49].mxu1 }
 0x979   :  { %v3782_v37 = vadd.f32 %v3781_v35, %v3780_v32  ;;  %v3490_v39 = vadd.f32 %v3480_v14, %v5115_v40 }
 0x97b   :  { %v3485_v30 = vadd.f32 %v3782_v37, %v3632_v47  ;;  %3498 = vadd.xlane.f32.xlu1 %v3490_v39 }
 0x97d   :  { %v3491_v54 = vadd.f32 %v3485_v30, %v5120_v49 }
 0x97f   :  { %3500 = vadd.xlane.f32.xlu0 %v3491_v54 }
 0x9bf   :  { %v3495_v59 = vpop.xlane.xlu1 %3494 }
 0x9c0   :  { %v3502_v41 = vmul.f32 0.0078125, %v3495_v59 }
 0x9c2   :  { %v3506_v44 = vsub.f32 %v3488_v21, %v3502_v41 }
 0x9c3   :  { %v3497_v48 = vpop.xlane.xlu0 %3496 }
 0x9c4   :  { %v3503_v29 = vmul.f32 0.0078125, %v3497_v48  ;;  %v3510_v11 = vmul.f32 %v3506_v44, %v3506_v44 }
 0x9c6   :  { %v3507_v53 = vsub.f32 %v3489_v25, %v3503_v29  ;;  %3514 = vadd.xlane.f32.xlu1 %v3510_v11 }
 0x9c8   :  { %v3511_v55 = vmul.f32 %v3507_v53, %v3507_v53 }
 0x9ca   :  { %3516 = vadd.xlane.f32.xlu0 %v3511_v55 }
 0xa08   :  { %v3499_v50 = vpop.xlane.xlu1 %3498 }
 0xa09   :  { %v3504_v27 = vmul.f32 0.0078125, %v3499_v50 }
 0xa0b   :  { %v3508_v58 = vsub.f32 %v3490_v39, %v3504_v27 }
 0xa0c   :  { %v3501_v52 = vpop.xlane.xlu0 %3500 }
 0xa0d   :  { %v3505_v40 = vmul.f32 0.0078125, %v3501_v52  ;;  %v3512_v61 = vmul.f32 %v3508_v58, %v3508_v58 }
 0xa0f   :  { %v3509_v43 = vsub.f32 %v3491_v54, %v3505_v40  ;;  %3518 = vadd.xlane.f32.xlu1 %v3512_v61 }
 0xa11   :  { %v3513_v49 = vmul.f32 %v3509_v43, %v3509_v43 }
 0xa13   :  { %3520 = vadd.xlane.f32.xlu0 %v3513_v49 }
 0xa53   :  { %v3515_v0 = vpop.xlane.xlu1 %3514 }
 0xa54   :  { %v3522_v51 = vmul.f32 0.0078125, %v3515_v0 }
 0xa56   :  { %v3526_v26 = vadd.f32 1e-05, %v3522_v51 }
 0xa57   :  { %v3517_v22 = vpop.xlane.xlu0 %3516 }
 0xa58   :  { %4314 = vrsqrt.f32 %v3526_v26  ;;  %v3523_v1 = vmul.f32 0.0078125, %v3517_v22 }
 0xa5a   :  { %v3527_v28 = vadd.f32 1e-05, %v3523_v1 }
 0xa5c   :  { %4316 = vrsqrt.f32 %v3527_v28 }
 0xa62   :  { %v4315_v2 = vpop.eup %4314 }
 0xa63   :  { %v3534_v4 = vmul.f32 %v4315_v2, %v3506_v44 }
 0xa65   :  { %v3544_v33 = vmul.f32 %v3633_v3, %v3534_v4 }
 0xa66   :  { %v4317_v38 = vpop.eup %4316 }
 0xa67   :  { %v3535_v31 = vmul.f32 %v4317_v38, %v3507_v53  ;;  %v3554_v6 = vadd.f32 %v3634_v5, %v3544_v33 }
 0xa69   :  { %v3545_v20 = vmul.f32 %v3633_v3, %v3535_v31  ;;  %3558 = vst [vmem:[#allocation11] sm:$0xff] %v3554_v6 }
 0xa6b   :  { %v3555_v18 = vadd.f32 %v3634_v5, %v3545_v20 }
 0xa6d   :  { %3559 = vst [vmem:[#allocation11 + $0x8] sm:$0xff] %v3555_v18 }
 0xa9c   :  { %v3519_v45 = vpop.xlane.xlu1 %3518 }
 0xa9d   :  { %v3524_v15 = vmul.f32 0.0078125, %v3519_v45 }
 0xa9f   :  { %v3528_v16 = vadd.f32 1e-05, %v3524_v15 }
 0xaa0   :  { %v3521_v8 = vpop.xlane.xlu0 %3520 }
 0xaa1   :  { %4318 = vrsqrt.f32 %v3528_v16  ;;  %v3525_v9 = vmul.f32 0.0078125, %v3521_v8 }
 0xaa3   :  { %v3529_v7 = vadd.f32 1e-05, %v3525_v9 }
 0xaa5   :  { %4320 = vrsqrt.f32 %v3529_v7 }
 0xaab   :  { %v4319_v23 = vpop.eup %4318 }
 0xaac   :  { %v3536_v60 = vmul.f32 %v4319_v23, %v3508_v58 }
 0xaae   :  { %v3546_v34 = vmul.f32 %v3633_v3, %v3536_v60 }
 0xaaf   :  { %v4321_v56 = vpop.eup %4320 }
 0xab0   :  { %v3537_v10 = vmul.f32 %v4321_v56, %v3509_v43  ;;  %v3556_v36 = vadd.f32 %v3634_v5, %v3546_v34 }
 0xab2   :  { %v3547_v47 = vmul.f32 %v3633_v3, %v3537_v10  ;;  %3560 = vst [vmem:[#allocation11 + $0x10] sm:$0xff] %v3556_v36 }
 0xab4   :  { %v3557_v12 = vadd.f32 %v3634_v5, %v3547_v47 }
 0xab6   :  { %3561 = vst [vmem:[#allocation11 + $0x18] sm:$0xff] %v3557_v12 }
 0xab7   :  { %4447 = shalt.err (!%p4444_p2)
}
 0xab8   :  { %s4448_s17 = scalar_lea.hbm %s5171_s13, 512 }
 0xab9   :  { %p4449_p3 = scmp.ne.s32.totalorder %s5171_s13, %s4448_s17  ;;  %p4452_p4 = scmp.lt.u32.totalorder %s4448_s17, %s5171_s13 }
 0xabb   :  { %p4454_p5 = pnand %p4452_p4, %p4449_p3 }
 0xabd   :  { %4457 = shalt.err (!%p4454_p5)
}
 0xabe   :  { %3573 = dma.vmem_to_hbm [thread:$0]  %s3568_s12, 512, %s5171_s13, [#allocation4], %s4473_s5, %s4473_s5, %s4474_s23  }
 0xabf   :  { %4464 = dma.done.wait [#allocation4], 512  }
 0xac0   :  { %4465 = vsyncadd [#allocation4], 4294966784 }
 0xac1   :  { %3577 = vsyncpa [#allocation3], 1 }
 0xac2   :  { %3578 = vsyncpa [#allocation6], 1 }
 0xac3   :  { %3579 = vsyncpa [#allocation9], 1 }
 0xac4   :  { %3580 = vsyncpa [#allocation4], 1 }

</bundles_post_ra>
